<compile_context>
chip_gen: v5e
topology: v5e:2x2
jax: 0.10.0
libtpu: 0.0.40
codegen_flags: <defaults>
</compile_context>

<pallas_src>
import jax
import jax.numpy as jnp
from jax.experimental import pallas as pl
from jax.experimental.pallas import tpu as pltpu
import numpy as np

POSE_DIM = 39
H_DIM = 32
LATENT_DIM = 16
PRED_LEN = 14

LANES = 128            # 4 * H_DIM == 128: the gate vector exactly fills one lane width
B_TILE = 8             # batch rows per grid step (one sublane tile)

LAT_OFF = POSE_DIM     # latent lives in lanes [39, 55) of the packed step-0 input
ONE_LANE = 127         # constant-1.0 lane (folds the step-0 bias into the matmul)

# Weight-slab row layout (all rows 128 lanes wide, f32):
W_PRE_ROW = 0          # [  0:128) fused step-0 weight:
                       #            rows 0:39  = W_ih^T
                       #            rows 39:55 = W_fc @ W_hh^T
                       #            row  127   = b_fc @ W_hh^T + b_ih + b_hh
W_REC_ROW = 128        # [128:160) W_rec = W_mlp^T @ W_ih^T + W_hh^T
W_OUT_ROW = 160        # [160:192) W_mlp^T in cols 0:39
B_REC_ROW = 192        # b_rec = b_mlp @ W_ih^T + b_ih + b_hh
B_OUT_ROW = 193        # b_mlp in lanes 0:39
W_ROWS = 200           # 194 live rows padded to a multiple of 8


def decoder_kernel(z0_ref, w_ref, out_ref, h_buf):
    """Full autoregressive decode for one 8-row batch tile, all VMEM-resident.

    z0_ref : (8, 128)            lanes 0:39 = last pose, 39:55 = latent, 127 = 1.0
    w_ref  : (200, 128)          packed weight/bias slab (layout above)
    out_ref: (pred_len, 8, 128)  lane-dense pose predictions
    h_buf  : (pred_len*8, 32)    VMEM scratch holding every step's hidden state
    """
    H = H_DIM
    pred_len = out_ref.shape[0]
    Bp = z0_ref.shape[0]                                   # == B_TILE == 8

    w_pre = w_ref[W_PRE_ROW:W_PRE_ROW + LANES, :]          # (128, 128)
    w_rec = w_ref[W_REC_ROW:W_REC_ROW + H, :]              # (32, 128)
    w_out = w_ref[W_OUT_ROW:W_OUT_ROW + H, :]              # (32, 128)
    # Hoist the recurrent-bias broadcast out of the unrolled loop (not CSE'd).
    b_rec = jnp.broadcast_to(w_ref[B_REC_ROW:B_REC_ROW + 1, :], (Bp, LANES))
    b_out = w_ref[B_OUT_ROW:B_OUT_ROW + 1, :]              # (1, 128)

    # Step-0 gates: last_s @ W_ih^T + FC(latent) @ W_hh^T + biases, fused into
    # ONE matmul (bias folded via the constant-1 lane of z0).
    gates = jnp.dot(z0_ref[...], w_pre, preferred_element_type=jnp.float32)
    c = jnp.zeros((Bp, H), jnp.float32)                    # decoder_c = 0

    for t in range(pred_len):                              # static unroll (pred_len=14)
        sig = jax.nn.sigmoid(gates)                        # one EUP pass covers i, f, o
        g_g = jnp.tanh(gates[:, 2 * H:3 * H])              # cell candidate
        i_g = sig[:, 0 * H:1 * H]
        f_g = sig[:, 1 * H:2 * H]
        o_g = sig[:, 3 * H:4 * H]
        c = f_g * c + i_g * g_g
        h = o_g * jnp.tanh(c)
        h_buf[t * Bp:(t + 1) * Bp, :] = h                  # stash; projection is off-chain
        if t + 1 < pred_len:
            # Folded recurrence: gates_{t+1} = h @ (W_mlp^T W_ih^T + W_hh^T) + b_rec
            gates = jnp.dot(h, w_rec, preferred_element_type=jnp.float32) + b_rec

    # One batched, throughput-friendly pose projection for all 14 steps.
    hs = h_buf[...]                                        # (pred_len*8, 32)
    preds = jnp.dot(hs, w_out, preferred_element_type=jnp.float32) + b_out
    for t in range(pred_len):
        out_ref[t] = preds[t * Bp:(t + 1) * Bp, :]         # static, full-tile stores


def pack_weights(params):
    """Fold FC / LSTM / mlp weights into one lane-dense (200, 128) f32 slab."""
    P, H, L = POSE_DIM, H_DIM, LATENT_DIM
    w_fc = np.asarray(params["w_fc"], np.float32)                    # (16, 32)
    b_fc = np.asarray(params["b_fc"], np.float32).reshape(1, H)
    w_ih = np.asarray(params["w_ih_t"], np.float32)                  # (39, 128)
    w_hh = np.asarray(params["w_hh_t"], np.float32)                  # (32, 128)
    b_lstm = np.asarray(params["b_lstm"], np.float32).reshape(1, 4 * H)
    w_mlp = np.asarray(params["w_mlp_t"], np.float32)                # (32, 39)
    b_mlp = np.asarray(params["b_mlp"], np.float32).reshape(1, P)

    slab = np.zeros((W_ROWS, LANES), np.float32)
    # Fused step-0 weight (consumes z0 = [last_s | latent | ... | 1]).
    slab[W_PRE_ROW:W_PRE_ROW + P, :] = w_ih
    slab[W_PRE_ROW + LAT_OFF:W_PRE_ROW + LAT_OFF + L, :] = w_fc @ w_hh
    slab[W_PRE_ROW + ONE_LANE, :] = (b_fc @ w_hh + b_lstm).reshape(-1)
    # Folded recurrent weight / bias.
    slab[W_REC_ROW:W_REC_ROW + H, :] = w_mlp @ w_ih + w_hh
    slab[B_REC_ROW, :] = (b_mlp @ w_ih + b_lstm).reshape(-1)
    # Output projection.
    slab[W_OUT_ROW:W_OUT_ROW + H, :P] = w_mlp
    slab[B_OUT_ROW, :P] = b_mlp.reshape(-1)
    return jnp.asarray(slab)


def decoder_forward(obs_s, latent, w_slab, pred_len=PRED_LEN):
    batch = obs_s.shape[1]
    bpad = max(B_TILE, ((batch + B_TILE - 1) // B_TILE) * B_TILE)
    nb = bpad // B_TILE

    # Packed step-0 input: pose | latent | zeros | constant-1 lane (bias fold).
    z0 = jnp.zeros((bpad, LANES), jnp.float32)
    z0 = z0.at[:batch, :POSE_DIM].set(obs_s[-1])
    z0 = z0.at[:batch, LAT_OFF:LAT_OFF + LATENT_DIM].set(latent)
    z0 = z0.at[:, ONE_LANE].set(1.0)

    out = pl.pallas_call(
        decoder_kernel,
        out_shape=jax.ShapeDtypeStruct((pred_len, bpad, LANES), jnp.float32),
        grid_spec=pltpu.PrefetchScalarGridSpec(
            num_scalar_prefetch=0,
            grid=(nb,),                                       # batch tiles; parallel on v7x
            in_specs=[
                pl.BlockSpec((B_TILE, LANES), lambda b: (b, 0)),
                pl.BlockSpec((W_ROWS, LANES), lambda b: (0, 0)),   # weights stay resident
            ],
            out_specs=pl.BlockSpec((pred_len, B_TILE, LANES), lambda b: (0, b, 0)),
            scratch_shapes=[pltpu.VMEM((pred_len * B_TILE, H_DIM), jnp.float32)],
        ),
        compiler_params=pltpu.CompilerParams(dimension_semantics=("parallel",)),
    )(z0, w_slab)
    return out[:, :batch, :POSE_DIM]                          # (pred_len, B, pose_dim)


def reference_forward(obs_s, latent, params, pred_len=PRED_LEN):
    """Pure-JAX, step-faithful reference of the PyTorch forward."""
    h = latent @ params["w_fc"] + params["b_fc"]
    c = jnp.zeros_like(h)
    x = obs_s[-1]
    H = H_DIM
    outs = []
    for _ in range(pred_len):
        gates = x @ params["w_ih_t"] + h @ params["w_hh_t"] + params["b_lstm"]
        i_g = jax.nn.sigmoid(gates[:, 0 * H:1 * H])
        f_g = jax.nn.sigmoid(gates[:, 1 * H:2 * H])
        g_g = jnp.tanh(gates[:, 2 * H:3 * H])
        o_g = jax.nn.sigmoid(gates[:, 3 * H:4 * H])
        c = f_g * c + i_g * g_g
        h = o_g * jnp.tanh(c)
        x = h @ params["w_mlp_t"] + params["b_mlp"]
        outs.append(x)
    return jnp.stack(outs, axis=0)


def init_params(key):
    ks = jax.random.split(key, 7)
    scale = 0.1
    return {
        # FC: Linear(latent_dim -> h_dim), stored transposed
        "w_fc": scale * jax.random.normal(ks[0], (LATENT_DIM, H_DIM), jnp.float32),
        "b_fc": scale * jax.random.normal(ks[1], (1, H_DIM), jnp.float32),
        # LSTM(pose_dim -> h_dim), weights transposed, PyTorch gate order i,f,g,o
        "w_ih_t": scale * jax.random.normal(ks[2], (POSE_DIM, 4 * H_DIM), jnp.float32),
        "w_hh_t": scale * jax.random.normal(ks[3], (H_DIM, 4 * H_DIM), jnp.float32),
        "b_lstm": scale * jax.random.normal(ks[4], (1, 4 * H_DIM), jnp.float32),
        # mlp: Linear(h_dim -> pose_dim), stored transposed
        "w_mlp_t": scale * jax.random.normal(ks[5], (H_DIM, POSE_DIM), jnp.float32),
        "b_mlp": scale * jax.random.normal(ks[6], (1, POSE_DIM), jnp.float32),
    }


if __name__ == "__main__":
    key = jax.random.PRNGKey(0)
    k_obs, k_lat, k_par = jax.random.split(key, 3)

    batch = 2
    obs_len = 8
    obs_s = jax.random.normal(k_obs, (obs_len, batch, POSE_DIM), jnp.float32)
    latent = jax.random.normal(k_lat, (batch, LATENT_DIM), jnp.float32)
    params = init_params(k_par)

    w_slab = pack_weights(params)        # built once; resident across calls

    preds = decoder_forward(obs_s, latent, w_slab, pred_len=PRED_LEN)
    preds = jax.block_until_ready(preds)

    ref = reference_forward(obs_s, latent, params, pred_len=PRED_LEN)
    assert preds.shape == (PRED_LEN, batch, POSE_DIM)
    # f32 everywhere (PyTorch's f64 cell state kept as f32); the algebraic fold
    # only changes f32 summation order, well within this tolerance.
    assert np.allclose(np.asarray(preds), np.asarray(ref), rtol=1e-3, atol=1e-3)

    print("KERNEL_OK")
</pallas_src>

<mosaic_0001>
module attributes {stable_mosaic.version = 11 : i64} {
  func.func @decoder_kernel(%arg0: i32, %arg1: memref<8x128xf32, #tpu.memory_space<vmem>>, %arg2: memref<200x128xf32, #tpu.memory_space<vmem>>, %arg3: memref<14x8x128xf32, #tpu.memory_space<vmem>>, %arg4: memref<112x32xf32, #tpu.memory_space<vmem>>) attributes {dimension_semantics = [#tpu.dimension_semantics<parallel>], iteration_bounds = array<i64: 1>, scalar_prefetch = 0 : i64, scratch_operands = 1 : i64, tpu.core_type = #tpu.core_type<tc>, window_params = [{transform_indices = @transform_0, window_bounds = array<i64: 8, 128>}, {pipeline_mode = #tpu.pipeline_mode<synchronous>, transform_indices = @transform_1, window_bounds = array<i64: 200, 128>}, {transform_indices = @transform_2, window_bounds = array<i64: 14, 8, 128>}]} {
    %c0 = arith.constant 0 : index
    %c0_0 = arith.constant 0 : index
    %0 = vector.load %arg2[%c0, %c0_0] : memref<200x128xf32, #tpu.memory_space<vmem>>, vector<128x128xf32>
    %c128 = arith.constant 128 : index
    %c0_1 = arith.constant 0 : index
    %1 = vector.load %arg2[%c128, %c0_1] : memref<200x128xf32, #tpu.memory_space<vmem>>, vector<32x128xf32>
    %c160 = arith.constant 160 : index
    %c0_2 = arith.constant 0 : index
    %2 = vector.load %arg2[%c160, %c0_2] : memref<200x128xf32, #tpu.memory_space<vmem>>, vector<32x128xf32>
    %c192 = arith.constant 192 : index
    %c0_3 = arith.constant 0 : index
    %3 = vector.load %arg2[%c192, %c0_3] : memref<200x128xf32, #tpu.memory_space<vmem>>, vector<1x128xf32>
    %4 = vector.shape_cast %3 : vector<1x128xf32> to vector<1x128xf32>
    %5 = vector.broadcast %4 : vector<1x128xf32> to vector<8x128xf32>
    %c193 = arith.constant 193 : index
    %c0_4 = arith.constant 0 : index
    %6 = vector.load %arg2[%c193, %c0_4] : memref<200x128xf32, #tpu.memory_space<vmem>>, vector<1x128xf32>
    %c0_5 = arith.constant 0 : index
    %c0_6 = arith.constant 0 : index
    %7 = vector.load %arg1[%c0_5, %c0_6] : memref<8x128xf32, #tpu.memory_space<vmem>>, vector<8x128xf32>
    %cst = arith.constant dense<0.000000e+00> : vector<8x128xf32>
    %8 = tpu.matmul %7, %0, %cst {dimension_numbers = #tpu.dot_dimension_numbers<[1], [0], [0], [1], [0, 0, 1, 1], [], []>} : vector<8x128xf32>, vector<128x128xf32>, vector<8x128xf32> -> vector<8x128xf32>
    %cst_7 = arith.constant 0.000000e+00 : f32
    %9 = vector.broadcast %cst_7 : f32 to vector<8x32xf32>
    %10 = arith.negf %8 : vector<8x128xf32>
    %11 = math.exp %10 : vector<8x128xf32>
    %cst_8 = arith.constant 1.000000e+00 : f32
    %12 = vector.broadcast %cst_8 : f32 to vector<8x128xf32>
    %13 = arith.addf %12, %11 : vector<8x128xf32>
    %14 = arith.divf %12, %13 : vector<8x128xf32>
    %15 = vector.extract_strided_slice %8 {offsets = [0, 64], sizes = [8, 32], strides = [1, 1]} : vector<8x128xf32> to vector<8x32xf32>
    %16 = math.tanh %15 : vector<8x32xf32>
    %17 = vector.extract_strided_slice %14 {offsets = [0, 0], sizes = [8, 32], strides = [1, 1]} : vector<8x128xf32> to vector<8x32xf32>
    %18 = vector.extract_strided_slice %14 {offsets = [0, 32], sizes = [8, 32], strides = [1, 1]} : vector<8x128xf32> to vector<8x32xf32>
    %19 = vector.extract_strided_slice %14 {offsets = [0, 96], sizes = [8, 32], strides = [1, 1]} : vector<8x128xf32> to vector<8x32xf32>
    %20 = arith.mulf %18, %9 : vector<8x32xf32>
    %21 = arith.mulf %17, %16 : vector<8x32xf32>
    %22 = arith.addf %20, %21 : vector<8x32xf32>
    %23 = math.tanh %22 : vector<8x32xf32>
    %24 = arith.mulf %19, %23 : vector<8x32xf32>
    %c0_9 = arith.constant 0 : index
    %c0_10 = arith.constant 0 : index
    %25 = vector.load %arg4[%c0_9, %c0_10] : memref<112x32xf32, #tpu.memory_space<vmem>>, vector<8x32xf32>
    tpu.vector_store %arg4[%c0_9, %c0_10], %24 {strides = array<i32>} : memref<112x32xf32, #tpu.memory_space<vmem>>, vector<8x32xf32>,
    %cst_11 = arith.constant dense<0.000000e+00> : vector<8x128xf32>
    %26 = tpu.matmul %24, %1, %cst_11 {dimension_numbers = #tpu.dot_dimension_numbers<[1], [0], [0], [1], [0, 0, 1, 1], [], []>} : vector<8x32xf32>, vector<32x128xf32>, vector<8x128xf32> -> vector<8x128xf32>
    %27 = arith.addf %26, %5 : vector<8x128xf32>
    %28 = arith.negf %27 : vector<8x128xf32>
    %29 = math.exp %28 : vector<8x128xf32>
    %cst_12 = arith.constant 1.000000e+00 : f32
    %30 = vector.broadcast %cst_12 : f32 to vector<8x128xf32>
    %31 = arith.addf %30, %29 : vector<8x128xf32>
    %32 = arith.divf %30, %31 : vector<8x128xf32>
    %33 = vector.extract_strided_slice %27 {offsets = [0, 64], sizes = [8, 32], strides = [1, 1]} : vector<8x128xf32> to vector<8x32xf32>
    %34 = math.tanh %33 : vector<8x32xf32>
    %35 = vector.extract_strided_slice %32 {offsets = [0, 0], sizes = [8, 32], strides = [1, 1]} : vector<8x128xf32> to vector<8x32xf32>
    %36 = vector.extract_strided_slice %32 {offsets = [0, 32], sizes = [8, 32], strides = [1, 1]} : vector<8x128xf32> to vector<8x32xf32>
    %37 = vector.extract_strided_slice %32 {offsets = [0, 96], sizes = [8, 32], strides = [1, 1]} : vector<8x128xf32> to vector<8x32xf32>
    %38 = arith.mulf %36, %22 : vector<8x32xf32>
    %39 = arith.mulf %35, %34 : vector<8x32xf32>
    %40 = arith.addf %38, %39 : vector<8x32xf32>
    %41 = math.tanh %40 : vector<8x32xf32>
    %42 = arith.mulf %37, %41 : vector<8x32xf32>
    %c8 = arith.constant 8 : index
    %c0_13 = arith.constant 0 : index
    %43 = vector.load %arg4[%c8, %c0_13] : memref<112x32xf32, #tpu.memory_space<vmem>>, vector<8x32xf32>
    tpu.vector_store %arg4[%c8, %c0_13], %42 {strides = array<i32>} : memref<112x32xf32, #tpu.memory_space<vmem>>, vector<8x32xf32>,
    %cst_14 = arith.constant dense<0.000000e+00> : vector<8x128xf32>
    %44 = tpu.matmul %42, %1, %cst_14 {dimension_numbers = #tpu.dot_dimension_numbers<[1], [0], [0], [1], [0, 0, 1, 1], [], []>} : vector<8x32xf32>, vector<32x128xf32>, vector<8x128xf32> -> vector<8x128xf32>
    %45 = arith.addf %44, %5 : vector<8x128xf32>
    %46 = arith.negf %45 : vector<8x128xf32>
    %47 = math.exp %46 : vector<8x128xf32>
    %cst_15 = arith.constant 1.000000e+00 : f32
    %48 = vector.broadcast %cst_15 : f32 to vector<8x128xf32>
    %49 = arith.addf %48, %47 : vector<8x128xf32>
    %50 = arith.divf %48, %49 : vector<8x128xf32>
    %51 = vector.extract_strided_slice %45 {offsets = [0, 64], sizes = [8, 32], strides = [1, 1]} : vector<8x128xf32> to vector<8x32xf32>
    %52 = math.tanh %51 : vector<8x32xf32>
    %53 = vector.extract_strided_slice %50 {offsets = [0, 0], sizes = [8, 32], strides = [1, 1]} : vector<8x128xf32> to vector<8x32xf32>
    %54 = vector.extract_strided_slice %50 {offsets = [0, 32], sizes = [8, 32], strides = [1, 1]} : vector<8x128xf32> to vector<8x32xf32>
    %55 = vector.extract_strided_slice %50 {offsets = [0, 96], sizes = [8, 32], strides = [1, 1]} : vector<8x128xf32> to vector<8x32xf32>
    %56 = arith.mulf %54, %40 : vector<8x32xf32>
    %57 = arith.mulf %53, %52 : vector<8x32xf32>
    %58 = arith.addf %56, %57 : vector<8x32xf32>
    %59 = math.tanh %58 : vector<8x32xf32>
    %60 = arith.mulf %55, %59 : vector<8x32xf32>
    %c16 = arith.constant 16 : index
    %c0_16 = arith.constant 0 : index
    %61 = vector.load %arg4[%c16, %c0_16] : memref<112x32xf32, #tpu.memory_space<vmem>>, vector<8x32xf32>
    tpu.vector_store %arg4[%c16, %c0_16], %60 {strides = array<i32>} : memref<112x32xf32, #tpu.memory_space<vmem>>, vector<8x32xf32>,
    %cst_17 = arith.constant dense<0.000000e+00> : vector<8x128xf32>
    %62 = tpu.matmul %60, %1, %cst_17 {dimension_numbers = #tpu.dot_dimension_numbers<[1], [0], [0], [1], [0, 0, 1, 1], [], []>} : vector<8x32xf32>, vector<32x128xf32>, vector<8x128xf32> -> vector<8x128xf32>
    %63 = arith.addf %62, %5 : vector<8x128xf32>
    %64 = arith.negf %63 : vector<8x128xf32>
    %65 = math.exp %64 : vector<8x128xf32>
    %cst_18 = arith.constant 1.000000e+00 : f32
    %66 = vector.broadcast %cst_18 : f32 to vector<8x128xf32>
    %67 = arith.addf %66, %65 : vector<8x128xf32>
    %68 = arith.divf %66, %67 : vector<8x128xf32>
    %69 = vector.extract_strided_slice %63 {offsets = [0, 64], sizes = [8, 32], strides = [1, 1]} : vector<8x128xf32> to vector<8x32xf32>
    %70 = math.tanh %69 : vector<8x32xf32>
    %71 = vector.extract_strided_slice %68 {offsets = [0, 0], sizes = [8, 32], strides = [1, 1]} : vector<8x128xf32> to vector<8x32xf32>
    %72 = vector.extract_strided_slice %68 {offsets = [0, 32], sizes = [8, 32], strides = [1, 1]} : vector<8x128xf32> to vector<8x32xf32>
    %73 = vector.extract_strided_slice %68 {offsets = [0, 96], sizes = [8, 32], strides = [1, 1]} : vector<8x128xf32> to vector<8x32xf32>
    %74 = arith.mulf %72, %58 : vector<8x32xf32>
    %75 = arith.mulf %71, %70 : vector<8x32xf32>
    %76 = arith.addf %74, %75 : vector<8x32xf32>
    %77 = math.tanh %76 : vector<8x32xf32>
    %78 = arith.mulf %73, %77 : vector<8x32xf32>
    %c24 = arith.constant 24 : index
    %c0_19 = arith.constant 0 : index
    %79 = vector.load %arg4[%c24, %c0_19] : memref<112x32xf32, #tpu.memory_space<vmem>>, vector<8x32xf32>
    tpu.vector_store %arg4[%c24, %c0_19], %78 {strides = array<i32>} : memref<112x32xf32, #tpu.memory_space<vmem>>, vector<8x32xf32>,
    %cst_20 = arith.constant dense<0.000000e+00> : vector<8x128xf32>
    %80 = tpu.matmul %78, %1, %cst_20 {dimension_numbers = #tpu.dot_dimension_numbers<[1], [0], [0], [1], [0, 0, 1, 1], [], []>} : vector<8x32xf32>, vector<32x128xf32>, vector<8x128xf32> -> vector<8x128xf32>
    %81 = arith.addf %80, %5 : vector<8x128xf32>
    %82 = arith.negf %81 : vector<8x128xf32>
    %83 = math.exp %82 : vector<8x128xf32>
    %cst_21 = arith.constant 1.000000e+00 : f32
    %84 = vector.broadcast %cst_21 : f32 to vector<8x128xf32>
    %85 = arith.addf %84, %83 : vector<8x128xf32>
    %86 = arith.divf %84, %85 : vector<8x128xf32>
    %87 = vector.extract_strided_slice %81 {offsets = [0, 64], sizes = [8, 32], strides = [1, 1]} : vector<8x128xf32> to vector<8x32xf32>
    %88 = math.tanh %87 : vector<8x32xf32>
    %89 = vector.extract_strided_slice %86 {offsets = [0, 0], sizes = [8, 32], strides = [1, 1]} : vector<8x128xf32> to vector<8x32xf32>
    %90 = vector.extract_strided_slice %86 {offsets = [0, 32], sizes = [8, 32], strides = [1, 1]} : vector<8x128xf32> to vector<8x32xf32>
    %91 = vector.extract_strided_slice %86 {offsets = [0, 96], sizes = [8, 32], strides = [1, 1]} : vector<8x128xf32> to vector<8x32xf32>
    %92 = arith.mulf %90, %76 : vector<8x32xf32>
    %93 = arith.mulf %89, %88 : vector<8x32xf32>
    %94 = arith.addf %92, %93 : vector<8x32xf32>
    %95 = math.tanh %94 : vector<8x32xf32>
    %96 = arith.mulf %91, %95 : vector<8x32xf32>
    %c32 = arith.constant 32 : index
    %c0_22 = arith.constant 0 : index
    %97 = vector.load %arg4[%c32, %c0_22] : memref<112x32xf32, #tpu.memory_space<vmem>>, vector<8x32xf32>
    tpu.vector_store %arg4[%c32, %c0_22], %96 {strides = array<i32>} : memref<112x32xf32, #tpu.memory_space<vmem>>, vector<8x32xf32>,
    %cst_23 = arith.constant dense<0.000000e+00> : vector<8x128xf32>
    %98 = tpu.matmul %96, %1, %cst_23 {dimension_numbers = #tpu.dot_dimension_numbers<[1], [0], [0], [1], [0, 0, 1, 1], [], []>} : vector<8x32xf32>, vector<32x128xf32>, vector<8x128xf32> -> vector<8x128xf32>
    %99 = arith.addf %98, %5 : vector<8x128xf32>
    %100 = arith.negf %99 : vector<8x128xf32>
    %101 = math.exp %100 : vector<8x128xf32>
    %cst_24 = arith.constant 1.000000e+00 : f32
    %102 = vector.broadcast %cst_24 : f32 to vector<8x128xf32>
    %103 = arith.addf %102, %101 : vector<8x128xf32>
    %104 = arith.divf %102, %103 : vector<8x128xf32>
    %105 = vector.extract_strided_slice %99 {offsets = [0, 64], sizes = [8, 32], strides = [1, 1]} : vector<8x128xf32> to vector<8x32xf32>
    %106 = math.tanh %105 : vector<8x32xf32>
    %107 = vector.extract_strided_slice %104 {offsets = [0, 0], sizes = [8, 32], strides = [1, 1]} : vector<8x128xf32> to vector<8x32xf32>
    %108 = vector.extract_strided_slice %104 {offsets = [0, 32], sizes = [8, 32], strides = [1, 1]} : vector<8x128xf32> to vector<8x32xf32>
    %109 = vector.extract_strided_slice %104 {offsets = [0, 96], sizes = [8, 32], strides = [1, 1]} : vector<8x128xf32> to vector<8x32xf32>
    %110 = arith.mulf %108, %94 : vector<8x32xf32>
    %111 = arith.mulf %107, %106 : vector<8x32xf32>
    %112 = arith.addf %110, %111 : vector<8x32xf32>
    %113 = math.tanh %112 : vector<8x32xf32>
    %114 = arith.mulf %109, %113 : vector<8x32xf32>
    %c40 = arith.constant 40 : index
    %c0_25 = arith.constant 0 : index
    %115 = vector.load %arg4[%c40, %c0_25] : memref<112x32xf32, #tpu.memory_space<vmem>>, vector<8x32xf32>
    tpu.vector_store %arg4[%c40, %c0_25], %114 {strides = array<i32>} : memref<112x32xf32, #tpu.memory_space<vmem>>, vector<8x32xf32>,
    %cst_26 = arith.constant dense<0.000000e+00> : vector<8x128xf32>
    %116 = tpu.matmul %114, %1, %cst_26 {dimension_numbers = #tpu.dot_dimension_numbers<[1], [0], [0], [1], [0, 0, 1, 1], [], []>} : vector<8x32xf32>, vector<32x128xf32>, vector<8x128xf32> -> vector<8x128xf32>
    %117 = arith.addf %116, %5 : vector<8x128xf32>
    %118 = arith.negf %117 : vector<8x128xf32>
    %119 = math.exp %118 : vector<8x128xf32>
    %cst_27 = arith.constant 1.000000e+00 : f32
    %120 = vector.broadcast %cst_27 : f32 to vector<8x128xf32>
    %121 = arith.addf %120, %119 : vector<8x128xf32>
    %122 = arith.divf %120, %121 : vector<8x128xf32>
    %123 = vector.extract_strided_slice %117 {offsets = [0, 64], sizes = [8, 32], strides = [1, 1]} : vector<8x128xf32> to vector<8x32xf32>
    %124 = math.tanh %123 : vector<8x32xf32>
    %125 = vector.extract_strided_slice %122 {offsets = [0, 0], sizes = [8, 32], strides = [1, 1]} : vector<8x128xf32> to vector<8x32xf32>
    %126 = vector.extract_strided_slice %122 {offsets = [0, 32], sizes = [8, 32], strides = [1, 1]} : vector<8x128xf32> to vector<8x32xf32>
    %127 = vector.extract_strided_slice %122 {offsets = [0, 96], sizes = [8, 32], strides = [1, 1]} : vector<8x128xf32> to vector<8x32xf32>
    %128 = arith.mulf %126, %112 : vector<8x32xf32>
    %129 = arith.mulf %125, %124 : vector<8x32xf32>
    %130 = arith.addf %128, %129 : vector<8x32xf32>
    %131 = math.tanh %130 : vector<8x32xf32>
    %132 = arith.mulf %127, %131 : vector<8x32xf32>
    %c48 = arith.constant 48 : index
    %c0_28 = arith.constant 0 : index
    %133 = vector.load %arg4[%c48, %c0_28] : memref<112x32xf32, #tpu.memory_space<vmem>>, vector<8x32xf32>
    tpu.vector_store %arg4[%c48, %c0_28], %132 {strides = array<i32>} : memref<112x32xf32, #tpu.memory_space<vmem>>, vector<8x32xf32>,
    %cst_29 = arith.constant dense<0.000000e+00> : vector<8x128xf32>
    %134 = tpu.matmul %132, %1, %cst_29 {dimension_numbers = #tpu.dot_dimension_numbers<[1], [0], [0], [1], [0, 0, 1, 1], [], []>} : vector<8x32xf32>, vector<32x128xf32>, vector<8x128xf32> -> vector<8x128xf32>
    %135 = arith.addf %134, %5 : vector<8x128xf32>
    %136 = arith.negf %135 : vector<8x128xf32>
    %137 = math.exp %136 : vector<8x128xf32>
    %cst_30 = arith.constant 1.000000e+00 : f32
    %138 = vector.broadcast %cst_30 : f32 to vector<8x128xf32>
    %139 = arith.addf %138, %137 : vector<8x128xf32>
    %140 = arith.divf %138, %139 : vector<8x128xf32>
    %141 = vector.extract_strided_slice %135 {offsets = [0, 64], sizes = [8, 32], strides = [1, 1]} : vector<8x128xf32> to vector<8x32xf32>
    %142 = math.tanh %141 : vector<8x32xf32>
    %143 = vector.extract_strided_slice %140 {offsets = [0, 0], sizes = [8, 32], strides = [1, 1]} : vector<8x128xf32> to vector<8x32xf32>
    %144 = vector.extract_strided_slice %140 {offsets = [0, 32], sizes = [8, 32], strides = [1, 1]} : vector<8x128xf32> to vector<8x32xf32>
    %145 = vector.extract_strided_slice %140 {offsets = [0, 96], sizes = [8, 32], strides = [1, 1]} : vector<8x128xf32> to vector<8x32xf32>
    %146 = arith.mulf %144, %130 : vector<8x32xf32>
    %147 = arith.mulf %143, %142 : vector<8x32xf32>
    %148 = arith.addf %146, %147 : vector<8x32xf32>
    %149 = math.tanh %148 : vector<8x32xf32>
    %150 = arith.mulf %145, %149 : vector<8x32xf32>
    %c56 = arith.constant 56 : index
    %c0_31 = arith.constant 0 : index
    %151 = vector.load %arg4[%c56, %c0_31] : memref<112x32xf32, #tpu.memory_space<vmem>>, vector<8x32xf32>
    tpu.vector_store %arg4[%c56, %c0_31], %150 {strides = array<i32>} : memref<112x32xf32, #tpu.memory_space<vmem>>, vector<8x32xf32>,
    %cst_32 = arith.constant dense<0.000000e+00> : vector<8x128xf32>
    %152 = tpu.matmul %150, %1, %cst_32 {dimension_numbers = #tpu.dot_dimension_numbers<[1], [0], [0], [1], [0, 0, 1, 1], [], []>} : vector<8x32xf32>, vector<32x128xf32>, vector<8x128xf32> -> vector<8x128xf32>
    %153 = arith.addf %152, %5 : vector<8x128xf32>
    %154 = arith.negf %153 : vector<8x128xf32>
    %155 = math.exp %154 : vector<8x128xf32>
    %cst_33 = arith.constant 1.000000e+00 : f32
    %156 = vector.broadcast %cst_33 : f32 to vector<8x128xf32>
    %157 = arith.addf %156, %155 : vector<8x128xf32>
    %158 = arith.divf %156, %157 : vector<8x128xf32>
    %159 = vector.extract_strided_slice %153 {offsets = [0, 64], sizes = [8, 32], strides = [1, 1]} : vector<8x128xf32> to vector<8x32xf32>
    %160 = math.tanh %159 : vector<8x32xf32>
    %161 = vector.extract_strided_slice %158 {offsets = [0, 0], sizes = [8, 32], strides = [1, 1]} : vector<8x128xf32> to vector<8x32xf32>
    %162 = vector.extract_strided_slice %158 {offsets = [0, 32], sizes = [8, 32], strides = [1, 1]} : vector<8x128xf32> to vector<8x32xf32>
    %163 = vector.extract_strided_slice %158 {offsets = [0, 96], sizes = [8, 32], strides = [1, 1]} : vector<8x128xf32> to vector<8x32xf32>
    %164 = arith.mulf %162, %148 : vector<8x32xf32>
    %165 = arith.mulf %161, %160 : vector<8x32xf32>
    %166 = arith.addf %164, %165 : vector<8x32xf32>
    %167 = math.tanh %166 : vector<8x32xf32>
    %168 = arith.mulf %163, %167 : vector<8x32xf32>
    %c64 = arith.constant 64 : index
    %c0_34 = arith.constant 0 : index
    %169 = vector.load %arg4[%c64, %c0_34] : memref<112x32xf32, #tpu.memory_space<vmem>>, vector<8x32xf32>
    tpu.vector_store %arg4[%c64, %c0_34], %168 {strides = array<i32>} : memref<112x32xf32, #tpu.memory_space<vmem>>, vector<8x32xf32>,
    %cst_35 = arith.constant dense<0.000000e+00> : vector<8x128xf32>
    %170 = tpu.matmul %168, %1, %cst_35 {dimension_numbers = #tpu.dot_dimension_numbers<[1], [0], [0], [1], [0, 0, 1, 1], [], []>} : vector<8x32xf32>, vector<32x128xf32>, vector<8x128xf32> -> vector<8x128xf32>
    %171 = arith.addf %170, %5 : vector<8x128xf32>
    %172 = arith.negf %171 : vector<8x128xf32>
    %173 = math.exp %172 : vector<8x128xf32>
    %cst_36 = arith.constant 1.000000e+00 : f32
    %174 = vector.broadcast %cst_36 : f32 to vector<8x128xf32>
    %175 = arith.addf %174, %173 : vector<8x128xf32>
    %176 = arith.divf %174, %175 : vector<8x128xf32>
    %177 = vector.extract_strided_slice %171 {offsets = [0, 64], sizes = [8, 32], strides = [1, 1]} : vector<8x128xf32> to vector<8x32xf32>
    %178 = math.tanh %177 : vector<8x32xf32>
    %179 = vector.extract_strided_slice %176 {offsets = [0, 0], sizes = [8, 32], strides = [1, 1]} : vector<8x128xf32> to vector<8x32xf32>
    %180 = vector.extract_strided_slice %176 {offsets = [0, 32], sizes = [8, 32], strides = [1, 1]} : vector<8x128xf32> to vector<8x32xf32>
    %181 = vector.extract_strided_slice %176 {offsets = [0, 96], sizes = [8, 32], strides = [1, 1]} : vector<8x128xf32> to vector<8x32xf32>
    %182 = arith.mulf %180, %166 : vector<8x32xf32>
    %183 = arith.mulf %179, %178 : vector<8x32xf32>
    %184 = arith.addf %182, %183 : vector<8x32xf32>
    %185 = math.tanh %184 : vector<8x32xf32>
    %186 = arith.mulf %181, %185 : vector<8x32xf32>
    %c72 = arith.constant 72 : index
    %c0_37 = arith.constant 0 : index
    %187 = vector.load %arg4[%c72, %c0_37] : memref<112x32xf32, #tpu.memory_space<vmem>>, vector<8x32xf32>
    tpu.vector_store %arg4[%c72, %c0_37], %186 {strides = array<i32>} : memref<112x32xf32, #tpu.memory_space<vmem>>, vector<8x32xf32>,
    %cst_38 = arith.constant dense<0.000000e+00> : vector<8x128xf32>
    %188 = tpu.matmul %186, %1, %cst_38 {dimension_numbers = #tpu.dot_dimension_numbers<[1], [0], [0], [1], [0, 0, 1, 1], [], []>} : vector<8x32xf32>, vector<32x128xf32>, vector<8x128xf32> -> vector<8x128xf32>
    %189 = arith.addf %188, %5 : vector<8x128xf32>
    %190 = arith.negf %189 : vector<8x128xf32>
    %191 = math.exp %190 : vector<8x128xf32>
    %cst_39 = arith.constant 1.000000e+00 : f32
    %192 = vector.broadcast %cst_39 : f32 to vector<8x128xf32>
    %193 = arith.addf %192, %191 : vector<8x128xf32>
    %194 = arith.divf %192, %193 : vector<8x128xf32>
    %195 = vector.extract_strided_slice %189 {offsets = [0, 64], sizes = [8, 32], strides = [1, 1]} : vector<8x128xf32> to vector<8x32xf32>
    %196 = math.tanh %195 : vector<8x32xf32>
    %197 = vector.extract_strided_slice %194 {offsets = [0, 0], sizes = [8, 32], strides = [1, 1]} : vector<8x128xf32> to vector<8x32xf32>
    %198 = vector.extract_strided_slice %194 {offsets = [0, 32], sizes = [8, 32], strides = [1, 1]} : vector<8x128xf32> to vector<8x32xf32>
    %199 = vector.extract_strided_slice %194 {offsets = [0, 96], sizes = [8, 32], strides = [1, 1]} : vector<8x128xf32> to vector<8x32xf32>
    %200 = arith.mulf %198, %184 : vector<8x32xf32>
    %201 = arith.mulf %197, %196 : vector<8x32xf32>
    %202 = arith.addf %200, %201 : vector<8x32xf32>
    %203 = math.tanh %202 : vector<8x32xf32>
    %204 = arith.mulf %199, %203 : vector<8x32xf32>
    %c80 = arith.constant 80 : index
    %c0_40 = arith.constant 0 : index
    %205 = vector.load %arg4[%c80, %c0_40] : memref<112x32xf32, #tpu.memory_space<vmem>>, vector<8x32xf32>
    tpu.vector_store %arg4[%c80, %c0_40], %204 {strides = array<i32>} : memref<112x32xf32, #tpu.memory_space<vmem>>, vector<8x32xf32>,
    %cst_41 = arith.constant dense<0.000000e+00> : vector<8x128xf32>
    %206 = tpu.matmul %204, %1, %cst_41 {dimension_numbers = #tpu.dot_dimension_numbers<[1], [0], [0], [1], [0, 0, 1, 1], [], []>} : vector<8x32xf32>, vector<32x128xf32>, vector<8x128xf32> -> vector<8x128xf32>
    %207 = arith.addf %206, %5 : vector<8x128xf32>
    %208 = arith.negf %207 : vector<8x128xf32>
    %209 = math.exp %208 : vector<8x128xf32>
    %cst_42 = arith.constant 1.000000e+00 : f32
    %210 = vector.broadcast %cst_42 : f32 to vector<8x128xf32>
    %211 = arith.addf %210, %209 : vector<8x128xf32>
    %212 = arith.divf %210, %211 : vector<8x128xf32>
    %213 = vector.extract_strided_slice %207 {offsets = [0, 64], sizes = [8, 32], strides = [1, 1]} : vector<8x128xf32> to vector<8x32xf32>
    %214 = math.tanh %213 : vector<8x32xf32>
    %215 = vector.extract_strided_slice %212 {offsets = [0, 0], sizes = [8, 32], strides = [1, 1]} : vector<8x128xf32> to vector<8x32xf32>
    %216 = vector.extract_strided_slice %212 {offsets = [0, 32], sizes = [8, 32], strides = [1, 1]} : vector<8x128xf32> to vector<8x32xf32>
    %217 = vector.extract_strided_slice %212 {offsets = [0, 96], sizes = [8, 32], strides = [1, 1]} : vector<8x128xf32> to vector<8x32xf32>
    %218 = arith.mulf %216, %202 : vector<8x32xf32>
    %219 = arith.mulf %215, %214 : vector<8x32xf32>
    %220 = arith.addf %218, %219 : vector<8x32xf32>
    %221 = math.tanh %220 : vector<8x32xf32>
    %222 = arith.mulf %217, %221 : vector<8x32xf32>
    %c88 = arith.constant 88 : index
    %c0_43 = arith.constant 0 : index
    %223 = vector.load %arg4[%c88, %c0_43] : memref<112x32xf32, #tpu.memory_space<vmem>>, vector<8x32xf32>
    tpu.vector_store %arg4[%c88, %c0_43], %222 {strides = array<i32>} : memref<112x32xf32, #tpu.memory_space<vmem>>, vector<8x32xf32>,
    %cst_44 = arith.constant dense<0.000000e+00> : vector<8x128xf32>
    %224 = tpu.matmul %222, %1, %cst_44 {dimension_numbers = #tpu.dot_dimension_numbers<[1], [0], [0], [1], [0, 0, 1, 1], [], []>} : vector<8x32xf32>, vector<32x128xf32>, vector<8x128xf32> -> vector<8x128xf32>
    %225 = arith.addf %224, %5 : vector<8x128xf32>
    %226 = arith.negf %225 : vector<8x128xf32>
    %227 = math.exp %226 : vector<8x128xf32>
    %cst_45 = arith.constant 1.000000e+00 : f32
    %228 = vector.broadcast %cst_45 : f32 to vector<8x128xf32>
    %229 = arith.addf %228, %227 : vector<8x128xf32>
    %230 = arith.divf %228, %229 : vector<8x128xf32>
    %231 = vector.extract_strided_slice %225 {offsets = [0, 64], sizes = [8, 32], strides = [1, 1]} : vector<8x128xf32> to vector<8x32xf32>
    %232 = math.tanh %231 : vector<8x32xf32>
    %233 = vector.extract_strided_slice %230 {offsets = [0, 0], sizes = [8, 32], strides = [1, 1]} : vector<8x128xf32> to vector<8x32xf32>
    %234 = vector.extract_strided_slice %230 {offsets = [0, 32], sizes = [8, 32], strides = [1, 1]} : vector<8x128xf32> to vector<8x32xf32>
    %235 = vector.extract_strided_slice %230 {offsets = [0, 96], sizes = [8, 32], strides = [1, 1]} : vector<8x128xf32> to vector<8x32xf32>
    %236 = arith.mulf %234, %220 : vector<8x32xf32>
    %237 = arith.mulf %233, %232 : vector<8x32xf32>
    %238 = arith.addf %236, %237 : vector<8x32xf32>
    %239 = math.tanh %238 : vector<8x32xf32>
    %240 = arith.mulf %235, %239 : vector<8x32xf32>
    %c96 = arith.constant 96 : index
    %c0_46 = arith.constant 0 : index
    %241 = vector.load %arg4[%c96, %c0_46] : memref<112x32xf32, #tpu.memory_space<vmem>>, vector<8x32xf32>
    tpu.vector_store %arg4[%c96, %c0_46], %240 {strides = array<i32>} : memref<112x32xf32, #tpu.memory_space<vmem>>, vector<8x32xf32>,
    %cst_47 = arith.constant dense<0.000000e+00> : vector<8x128xf32>
    %242 = tpu.matmul %240, %1, %cst_47 {dimension_numbers = #tpu.dot_dimension_numbers<[1], [0], [0], [1], [0, 0, 1, 1], [], []>} : vector<8x32xf32>, vector<32x128xf32>, vector<8x128xf32> -> vector<8x128xf32>
    %243 = arith.addf %242, %5 : vector<8x128xf32>
    %244 = arith.negf %243 : vector<8x128xf32>
    %245 = math.exp %244 : vector<8x128xf32>
    %cst_48 = arith.constant 1.000000e+00 : f32
    %246 = vector.broadcast %cst_48 : f32 to vector<8x128xf32>
    %247 = arith.addf %246, %245 : vector<8x128xf32>
    %248 = arith.divf %246, %247 : vector<8x128xf32>
    %249 = vector.extract_strided_slice %243 {offsets = [0, 64], sizes = [8, 32], strides = [1, 1]} : vector<8x128xf32> to vector<8x32xf32>
    %250 = math.tanh %249 : vector<8x32xf32>
    %251 = vector.extract_strided_slice %248 {offsets = [0, 0], sizes = [8, 32], strides = [1, 1]} : vector<8x128xf32> to vector<8x32xf32>
    %252 = vector.extract_strided_slice %248 {offsets = [0, 32], sizes = [8, 32], strides = [1, 1]} : vector<8x128xf32> to vector<8x32xf32>
    %253 = vector.extract_strided_slice %248 {offsets = [0, 96], sizes = [8, 32], strides = [1, 1]} : vector<8x128xf32> to vector<8x32xf32>
    %254 = arith.mulf %252, %238 : vector<8x32xf32>
    %255 = arith.mulf %251, %250 : vector<8x32xf32>
    %256 = arith.addf %254, %255 : vector<8x32xf32>
    %257 = math.tanh %256 : vector<8x32xf32>
    %258 = arith.mulf %253, %257 : vector<8x32xf32>
    %c104 = arith.constant 104 : index
    %c0_49 = arith.constant 0 : index
    %259 = vector.load %arg4[%c104, %c0_49] : memref<112x32xf32, #tpu.memory_space<vmem>>, vector<8x32xf32>
    tpu.vector_store %arg4[%c104, %c0_49], %258 {strides = array<i32>} : memref<112x32xf32, #tpu.memory_space<vmem>>, vector<8x32xf32>,
    %c0_50 = arith.constant 0 : index
    %c0_51 = arith.constant 0 : index
    %260 = vector.load %arg4[%c0_50, %c0_51] : memref<112x32xf32, #tpu.memory_space<vmem>>, vector<112x32xf32>
    %cst_52 = arith.constant dense<0.000000e+00> : vector<112x128xf32>
    %261 = tpu.matmul %260, %2, %cst_52 {dimension_numbers = #tpu.dot_dimension_numbers<[1], [0], [0], [1], [0, 0, 1, 1], [], []>} : vector<112x32xf32>, vector<32x128xf32>, vector<112x128xf32> -> vector<112x128xf32>
    %262 = vector.broadcast %6 : vector<1x128xf32> to vector<112x128xf32>
    %263 = arith.addf %261, %262 : vector<112x128xf32>
    %264 = vector.extract_strided_slice %263 {offsets = [0, 0], sizes = [8, 128], strides = [1, 1]} : vector<112x128xf32> to vector<8x128xf32>
    %c0_53 = arith.constant 0 : index
    %c0_54 = arith.constant 0 : index
    %c0_55 = arith.constant 0 : index
    %265 = vector.load %arg3[%c0_53, %c0_54, %c0_55] : memref<14x8x128xf32, #tpu.memory_space<vmem>>, vector<1x8x128xf32>
    %266 = vector.shape_cast %265 : vector<1x8x128xf32> to vector<8x128xf32>
    %267 = vector.shape_cast %264 : vector<8x128xf32> to vector<1x8x128xf32>
    tpu.vector_store %arg3[%c0_53, %c0_54, %c0_55], %267 {strides = array<i32>} : memref<14x8x128xf32, #tpu.memory_space<vmem>>, vector<1x8x128xf32>,
    %268 = vector.extract_strided_slice %263 {offsets = [8, 0], sizes = [8, 128], strides = [1, 1]} : vector<112x128xf32> to vector<8x128xf32>
    %c1 = arith.constant 1 : index
    %c0_56 = arith.constant 0 : index
    %c0_57 = arith.constant 0 : index
    %269 = vector.load %arg3[%c1, %c0_56, %c0_57] : memref<14x8x128xf32, #tpu.memory_space<vmem>>, vector<1x8x128xf32>
    %270 = vector.shape_cast %269 : vector<1x8x128xf32> to vector<8x128xf32>
    %271 = vector.shape_cast %268 : vector<8x128xf32> to vector<1x8x128xf32>
    tpu.vector_store %arg3[%c1, %c0_56, %c0_57], %271 {strides = array<i32>} : memref<14x8x128xf32, #tpu.memory_space<vmem>>, vector<1x8x128xf32>,
    %272 = vector.extract_strided_slice %263 {offsets = [16, 0], sizes = [8, 128], strides = [1, 1]} : vector<112x128xf32> to vector<8x128xf32>
    %c2 = arith.constant 2 : index
    %c0_58 = arith.constant 0 : index
    %c0_59 = arith.constant 0 : index
    %273 = vector.load %arg3[%c2, %c0_58, %c0_59] : memref<14x8x128xf32, #tpu.memory_space<vmem>>, vector<1x8x128xf32>
    %274 = vector.shape_cast %273 : vector<1x8x128xf32> to vector<8x128xf32>
    %275 = vector.shape_cast %272 : vector<8x128xf32> to vector<1x8x128xf32>
    tpu.vector_store %arg3[%c2, %c0_58, %c0_59], %275 {strides = array<i32>} : memref<14x8x128xf32, #tpu.memory_space<vmem>>, vector<1x8x128xf32>,
    %276 = vector.extract_strided_slice %263 {offsets = [24, 0], sizes = [8, 128], strides = [1, 1]} : vector<112x128xf32> to vector<8x128xf32>
    %c3 = arith.constant 3 : index
    %c0_60 = arith.constant 0 : index
    %c0_61 = arith.constant 0 : index
    %277 = vector.load %arg3[%c3, %c0_60, %c0_61] : memref<14x8x128xf32, #tpu.memory_space<vmem>>, vector<1x8x128xf32>
    %278 = vector.shape_cast %277 : vector<1x8x128xf32> to vector<8x128xf32>
    %279 = vector.shape_cast %276 : vector<8x128xf32> to vector<1x8x128xf32>
    tpu.vector_store %arg3[%c3, %c0_60, %c0_61], %279 {strides = array<i32>} : memref<14x8x128xf32, #tpu.memory_space<vmem>>, vector<1x8x128xf32>,
    %280 = vector.extract_strided_slice %263 {offsets = [32, 0], sizes = [8, 128], strides = [1, 1]} : vector<112x128xf32> to vector<8x128xf32>
    %c4 = arith.constant 4 : index
    %c0_62 = arith.constant 0 : index
    %c0_63 = arith.constant 0 : index
    %281 = vector.load %arg3[%c4, %c0_62, %c0_63] : memref<14x8x128xf32, #tpu.memory_space<vmem>>, vector<1x8x128xf32>
    %282 = vector.shape_cast %281 : vector<1x8x128xf32> to vector<8x128xf32>
    %283 = vector.shape_cast %280 : vector<8x128xf32> to vector<1x8x128xf32>
    tpu.vector_store %arg3[%c4, %c0_62, %c0_63], %283 {strides = array<i32>} : memref<14x8x128xf32, #tpu.memory_space<vmem>>, vector<1x8x128xf32>,
    %284 = vector.extract_strided_slice %263 {offsets = [40, 0], sizes = [8, 128], strides = [1, 1]} : vector<112x128xf32> to vector<8x128xf32>
    %c5 = arith.constant 5 : index
    %c0_64 = arith.constant 0 : index
    %c0_65 = arith.constant 0 : index
    %285 = vector.load %arg3[%c5, %c0_64, %c0_65] : memref<14x8x128xf32, #tpu.memory_space<vmem>>, vector<1x8x128xf32>
    %286 = vector.shape_cast %285 : vector<1x8x128xf32> to vector<8x128xf32>
    %287 = vector.shape_cast %284 : vector<8x128xf32> to vector<1x8x128xf32>
    tpu.vector_store %arg3[%c5, %c0_64, %c0_65], %287 {strides = array<i32>} : memref<14x8x128xf32, #tpu.memory_space<vmem>>, vector<1x8x128xf32>,
    %288 = vector.extract_strided_slice %263 {offsets = [48, 0], sizes = [8, 128], strides = [1, 1]} : vector<112x128xf32> to vector<8x128xf32>
    %c6 = arith.constant 6 : index
    %c0_66 = arith.constant 0 : index
    %c0_67 = arith.constant 0 : index
    %289 = vector.load %arg3[%c6, %c0_66, %c0_67] : memref<14x8x128xf32, #tpu.memory_space<vmem>>, vector<1x8x128xf32>
    %290 = vector.shape_cast %289 : vector<1x8x128xf32> to vector<8x128xf32>
    %291 = vector.shape_cast %288 : vector<8x128xf32> to vector<1x8x128xf32>
    tpu.vector_store %arg3[%c6, %c0_66, %c0_67], %291 {strides = array<i32>} : memref<14x8x128xf32, #tpu.memory_space<vmem>>, vector<1x8x128xf32>,
    %292 = vector.extract_strided_slice %263 {offsets = [56, 0], sizes = [8, 128], strides = [1, 1]} : vector<112x128xf32> to vector<8x128xf32>
    %c7 = arith.constant 7 : index
    %c0_68 = arith.constant 0 : index
    %c0_69 = arith.constant 0 : index
    %293 = vector.load %arg3[%c7, %c0_68, %c0_69] : memref<14x8x128xf32, #tpu.memory_space<vmem>>, vector<1x8x128xf32>
    %294 = vector.shape_cast %293 : vector<1x8x128xf32> to vector<8x128xf32>
    %295 = vector.shape_cast %292 : vector<8x128xf32> to vector<1x8x128xf32>
    tpu.vector_store %arg3[%c7, %c0_68, %c0_69], %295 {strides = array<i32>} : memref<14x8x128xf32, #tpu.memory_space<vmem>>, vector<1x8x128xf32>,
    %296 = vector.extract_strided_slice %263 {offsets = [64, 0], sizes = [8, 128], strides = [1, 1]} : vector<112x128xf32> to vector<8x128xf32>
    %c8_70 = arith.constant 8 : index
    %c0_71 = arith.constant 0 : index
    %c0_72 = arith.constant 0 : index
    %297 = vector.load %arg3[%c8_70, %c0_71, %c0_72] : memref<14x8x128xf32, #tpu.memory_space<vmem>>, vector<1x8x128xf32>
    %298 = vector.shape_cast %297 : vector<1x8x128xf32> to vector<8x128xf32>
    %299 = vector.shape_cast %296 : vector<8x128xf32> to vector<1x8x128xf32>
    tpu.vector_store %arg3[%c8_70, %c0_71, %c0_72], %299 {strides = array<i32>} : memref<14x8x128xf32, #tpu.memory_space<vmem>>, vector<1x8x128xf32>,
    %300 = vector.extract_strided_slice %263 {offsets = [72, 0], sizes = [8, 128], strides = [1, 1]} : vector<112x128xf32> to vector<8x128xf32>
    %c9 = arith.constant 9 : index
    %c0_73 = arith.constant 0 : index
    %c0_74 = arith.constant 0 : index
    %301 = vector.load %arg3[%c9, %c0_73, %c0_74] : memref<14x8x128xf32, #tpu.memory_space<vmem>>, vector<1x8x128xf32>
    %302 = vector.shape_cast %301 : vector<1x8x128xf32> to vector<8x128xf32>
    %303 = vector.shape_cast %300 : vector<8x128xf32> to vector<1x8x128xf32>
    tpu.vector_store %arg3[%c9, %c0_73, %c0_74], %303 {strides = array<i32>} : memref<14x8x128xf32, #tpu.memory_space<vmem>>, vector<1x8x128xf32>,
    %304 = vector.extract_strided_slice %263 {offsets = [80, 0], sizes = [8, 128], strides = [1, 1]} : vector<112x128xf32> to vector<8x128xf32>
    %c10 = arith.constant 10 : index
    %c0_75 = arith.constant 0 : index
    %c0_76 = arith.constant 0 : index
    %305 = vector.load %arg3[%c10, %c0_75, %c0_76] : memref<14x8x128xf32, #tpu.memory_space<vmem>>, vector<1x8x128xf32>
    %306 = vector.shape_cast %305 : vector<1x8x128xf32> to vector<8x128xf32>
    %307 = vector.shape_cast %304 : vector<8x128xf32> to vector<1x8x128xf32>
    tpu.vector_store %arg3[%c10, %c0_75, %c0_76], %307 {strides = array<i32>} : memref<14x8x128xf32, #tpu.memory_space<vmem>>, vector<1x8x128xf32>,
    %308 = vector.extract_strided_slice %263 {offsets = [88, 0], sizes = [8, 128], strides = [1, 1]} : vector<112x128xf32> to vector<8x128xf32>
    %c11 = arith.constant 11 : index
    %c0_77 = arith.constant 0 : index
    %c0_78 = arith.constant 0 : index
    %309 = vector.load %arg3[%c11, %c0_77, %c0_78] : memref<14x8x128xf32, #tpu.memory_space<vmem>>, vector<1x8x128xf32>
    %310 = vector.shape_cast %309 : vector<1x8x128xf32> to vector<8x128xf32>
    %311 = vector.shape_cast %308 : vector<8x128xf32> to vector<1x8x128xf32>
    tpu.vector_store %arg3[%c11, %c0_77, %c0_78], %311 {strides = array<i32>} : memref<14x8x128xf32, #tpu.memory_space<vmem>>, vector<1x8x128xf32>,
    %312 = vector.extract_strided_slice %263 {offsets = [96, 0], sizes = [8, 128], strides = [1, 1]} : vector<112x128xf32> to vector<8x128xf32>
    %c12 = arith.constant 12 : index
    %c0_79 = arith.constant 0 : index
    %c0_80 = arith.constant 0 : index
    %313 = vector.load %arg3[%c12, %c0_79, %c0_80] : memref<14x8x128xf32, #tpu.memory_space<vmem>>, vector<1x8x128xf32>
    %314 = vector.shape_cast %313 : vector<1x8x128xf32> to vector<8x128xf32>
    %315 = vector.shape_cast %312 : vector<8x128xf32> to vector<1x8x128xf32>
    tpu.vector_store %arg3[%c12, %c0_79, %c0_80], %315 {strides = array<i32>} : memref<14x8x128xf32, #tpu.memory_space<vmem>>, vector<1x8x128xf32>,
    %316 = vector.extract_strided_slice %263 {offsets = [104, 0], sizes = [8, 128], strides = [1, 1]} : vector<112x128xf32> to vector<8x128xf32>
    %c13 = arith.constant 13 : index
    %c0_81 = arith.constant 0 : index
    %c0_82 = arith.constant 0 : index
    %317 = vector.load %arg3[%c13, %c0_81, %c0_82] : memref<14x8x128xf32, #tpu.memory_space<vmem>>, vector<1x8x128xf32>
    %318 = vector.shape_cast %317 : vector<1x8x128xf32> to vector<8x128xf32>
    %319 = vector.shape_cast %316 : vector<8x128xf32> to vector<1x8x128xf32>
    tpu.vector_store %arg3[%c13, %c0_81, %c0_82], %319 {strides = array<i32>} : memref<14x8x128xf32, #tpu.memory_space<vmem>>, vector<1x8x128xf32>,
    return
  }
  func.func @transform_0(%arg0: i32) -> (i32, i32) {
    %c0_i32 = arith.constant 0 : i32
    %c0_i32_0 = arith.constant 0 : i32
    return %arg0, %c0_i32 : i32, i32
  }
  func.func @transform_1(%arg0: i32) -> (i32, i32) {
    %c0_i32 = arith.constant 0 : i32
    %c0_i32_0 = arith.constant 0 : i32
    %c0_i32_1 = arith.constant 0 : i32
    return %c0_i32, %c0_i32_0 : i32, i32
  }
  func.func @transform_2(%arg0: i32) -> (i32, i32, i32) {
    %c0_i32 = arith.constant 0 : i32
    %c0_i32_0 = arith.constant 0 : i32
    %c0_i32_1 = arith.constant 0 : i32
    return %c0_i32, %arg0, %c0_i32_0 : i32, i32, i32
  }
}

</mosaic_0001>

<bundles_post_ra>
// kernel: tpu_custom_call.1
= control target key start
LH: loop header
LB: loop body
LE: loop exit
PB: predicated region body
PF: predicated region fallthrough
CT: control target
= control target key end

     0   :  { %7 = vsyncpa [#allocation4], 0  ;;  %s1612_s0 = inlined_call_operand.hbm [shape: f32[8,128], index: 0, kind: input, shape index: {}]   ;;  %s1613_s1 = inlined_call_operand.hbm [shape: f32[200,128], index: 1, kind: input, shape index: {}]   ;;  %s1614_s2 = inlined_call_operand.hbm [shape: f32[14,8,128], index: 2, kind: output, shape index: {}]  }
   0x1   :  { %8 = vsyncpa [#allocation7], 0 }
   0x2   :  { %9 = vsyncpa [#allocation5], 0  ;;  %s15_s11 = sshll.u32 %s1612_s0, 4  ;;  %s1381_s12 = smov [#allocation3]   ;;  %s16_s11 = int_to_ptr.hbm [resolvable:$true] %s15_s11 }
   0x3   :  { %s17_s13 = sshll.u32 %s1381_s12, 4  ;;  %s25_s16 = sshll.u32 %s1613_s1, 4  ;;  %s18_s13 = int_to_ptr.vmem [resolvable:$true] %s17_s13  ;;  %s26_s16 = int_to_ptr.hbm [resolvable:$true] %s25_s16 }
   0x4   :  { %20 = dma.hbm_to_vmem [thread:$0]  %s16_s11, 128, %s18_s13, [#allocation4]  }
   0x5   :  { %s1382_s17 = smov [#allocation6]   ;;  %s1383_s19 = smov 128  }
   0x6   :  { %s27_s18 = sshll.u32 %s1382_s17, 4  ;;  %s1384_s20 = smov 8   ;;  %s28_s18 = int_to_ptr.vmem [resolvable:$true] %s27_s18 }
   0x7   :  { %33 = dma.hbm_to_vmem [thread:$0]  %s26_s16, 3200, %s28_s18, [#allocation7], %s1383_s19, %s1383_s19, %s1384_s20  }
   0x8   :  { %1375 = dma.done.wait [#allocation4], 128  }
   0x9   :  { %1376 = vsyncadd [#allocation4], 4294967168 }
   0xa   :  { %1377 = dma.done.wait [#allocation7], 3200  }
   0xb   :  { %1378 = vsyncadd [#allocation7], 4294964096  ;;  %v57_v0 = vld [vmem:[#allocation6 + $0x78] sm:$0xff]  ;;  %v56_v1 = vld [vmem:[#allocation6 + $0x70] sm:$0xff]  ;;  %s1385_s0 = smov 64   ;;  %s1386_s1 = smov 32  }
   0xc   :  { %70 = vmatpush.msra.mxu0 %v57_v0  ;;  %v55_v2 = vld [vmem:[#allocation6 + $0x68] sm:$0xff]  ;;  %v54_v3 = vld [vmem:[#allocation6 + $0x60] sm:$0xff]  ;;  %v53_v4 = vld [vmem:[#allocation6 + $0x58] sm:$0xff]  ;;  %vm131_vm4 = vcmask 261120   ;;  %s1387_s21 = smov [#allocation8]   ;;  %s1114_s25 = sshll.u32 %s1614_s2, 4  ;;  %s1115_s25 = int_to_ptr.hbm [resolvable:$true] %s1114_s25 }
   0xd   :  { %v52_v5 = vld [vmem:[#allocation6 + $0x50] sm:$0xff]  ;;  %v51_v6 = vld [vmem:[#allocation6 + $0x48] sm:$0xff]  ;;  %v50_v7 = vld [vmem:[#allocation6 + $0x40] sm:$0xff]  ;;  %s1112_s22 = sshll.u32 %s1387_s21, 4  ;;  %s1113_s22 = int_to_ptr.vmem [resolvable:$true] %s1112_s22 }
   0xe   :  { %71 = vmatpush.msra.mxu0 %v56_v1  ;;  %v49_v8 = vld [vmem:[#allocation6 + $0x38] sm:$0xff]  ;;  %v48_v9 = vld [vmem:[#allocation6 + $0x30] sm:$0xff]  ;;  %v47_v10 = vld [vmem:[#allocation6 + $0x28] sm:$0xff] }
   0xf   :  { %v46_v11 = vld [vmem:[#allocation6 + $0x20] sm:$0xff]  ;;  %v45_v12 = vld [vmem:[#allocation6 + $0x18] sm:$0xff]  ;;  %v44_v13 = vld [vmem:[#allocation6 + $0x10] sm:$0xff] }
  0x10   :  { %72 = vmatpush.msra.mxu0 %v55_v2  ;;  %v43_v14 = vld [vmem:[#allocation6 + $0x8] sm:$0xff]  ;;  %v42_v15 = vld [vmem:[#allocation6] sm:$0xff]  ;;  %v69_v16 = vld [vmem:[#allocation3] sm:$0xff] }
  0x11   :  { %v1418_v38 = vld [vmem:[#allocation6 + $0x98] sm:$0xff]  ;;  %v1420_v39 = vld [vmem:[#allocation6 + $0x90] sm:$0xff]  ;;  %v1424_v40 = vld [vmem:[#allocation6 + $0x88] sm:$0xff] }
  0x12   :  { %73 = vmatpush.msra.mxu0 %v54_v3  ;;  %147 = vmatpush.msra.mxu1 %v1418_v38  ;;  %v1430_v41 = vld [vmem:[#allocation6 + $0x80] sm:$0xff] }
  0x13   :  { %211 = vmatpush.msra.mxu2 %v1418_v38  ;;  %275 = vmatpush.msra.mxu3 %v1418_v38  ;;  %v1461_v45 = vld [vmem:[#allocation6 + $0xc0] ss:$0 sm:$0xff] }
  0x14   :  { %74 = vmatpush.msra.mxu0 %v53_v4  ;;  %148 = vmatpush.msra.mxu1 %v1420_v39 }
  0x15   :  { %212 = vmatpush.msra.mxu2 %v1420_v39  ;;  %276 = vmatpush.msra.mxu3 %v1420_v39 }
  0x16   :  { %75 = vmatpush.msra.mxu0 %v52_v5  ;;  %149 = vmatpush.msra.mxu1 %v1424_v40 }
  0x17   :  { %213 = vmatpush.msra.mxu2 %v1424_v40  ;;  %277 = vmatpush.msra.mxu3 %v1424_v40 }
  0x18   :  { %76 = vmatpush.msra.mxu0 %v51_v6  ;;  %150 = vmatpush.msra.mxu1 %v1430_v41 }
  0x19   :  { %214 = vmatpush.msra.mxu2 %v1430_v41  ;;  %278 = vmatpush.msra.mxu3 %v1430_v41 }
  0x1a   :  { %77 = vmatpush.msra.mxu0 %v50_v7  ;;  %339 = vmatpush.msrb.mxu1 %v1418_v38 }
  0x1b   :  { %403 = vmatpush.msrb.mxu2 %v1418_v38  ;;  %467 = vmatpush.msrb.mxu3 %v1418_v38 }
  0x1c   :  { %78 = vmatpush.msra.mxu0 %v49_v8  ;;  %340 = vmatpush.msrb.mxu1 %v1420_v39 }
  0x1d   :  { %404 = vmatpush.msrb.mxu2 %v1420_v39  ;;  %468 = vmatpush.msrb.mxu3 %v1420_v39 }
  0x1e   :  { %79 = vmatpush.msra.mxu0 %v48_v9  ;;  %341 = vmatpush.msrb.mxu1 %v1424_v40 }
  0x1f   :  { %405 = vmatpush.msrb.mxu2 %v1424_v40  ;;  %469 = vmatpush.msrb.mxu3 %v1424_v40 }
  0x20   :  { %80 = vmatpush.msra.mxu0 %v47_v10  ;;  %342 = vmatpush.msrb.mxu1 %v1430_v41 }
  0x21   :  { %406 = vmatpush.msrb.mxu2 %v1430_v41  ;;  %470 = vmatpush.msrb.mxu3 %v1430_v41 }
  0x22   :  { %81 = vmatpush.msra.mxu0 %v46_v11 }
  0x24   :  { %82 = vmatpush.msra.mxu0 %v45_v12 }
  0x26   :  { %83 = vmatpush.msra.mxu0 %v44_v13 }
  0x28   :  { %84 = vmatpush.msra.mxu0 %v43_v14 }
  0x2a   :  { %85 = vmatpush.msra.mxu0 %v42_v15 }
  0x2b   :  { %86 = vmatmul.f32.vlgmr.msra.gmra.mxu0 %v69_v16 }
  0x2c   :  { %915 = vmatpush.msrb.mxu0 %v1418_v38 }
  0x2e   :  { %916 = vmatpush.msrb.mxu0 %v1420_v39 }
  0x30   :  { %917 = vmatpush.msrb.mxu0 %v1424_v40 }
  0x32   :  { %918 = vmatpush.msrb.mxu0 %v1430_v41 }
  0xa8   :  { %v87_v17 = vpop.f32.mrf.mxu0 }
  0xa9   :  { %1190 = vtanh.f32 %v87_v17  ;;  %v1128_v19 = vmul.f32 -1.442695, %v87_v17 }
  0xab   :  { %1192 = vpow2.f32 %v1128_v19 }
  0xaf   :  { %v1191_v18 = vpop.eup %1190 }
  0xb0   :  { %112 = vrot.lane.b32.xlu0 %v1191_v18, %s1385_s0 }
  0xb1   :  { %v1193_v20 = vpop.eup %1192 }
  0xb2   :  { %v93_v21 = vadd.f32 1.0, %v1193_v20 }
  0xb4   :  { %1194 = vrcp.f32 %v93_v21  ;;  %v105_v27 = vand.u32 2147483648, %v93_v21  ;;  %vm99_vm1 = vweird.f32 %v93_v21  ;;  %v103_v28 = vand.u32 2147483647, %v93_v21 }
  0xb6   :  { %v106_v30 = vor.u32 1.1754944e-38, %v105_v27  ;;  %vm104_vm3 = vcmp.eq.f32.partialorder %v103_v28, 8.507059e+37 }
  0xba   :  { %v1195_v22 = vpop.eup %1194 }
  0xbb   :  { %v95_v23 = vmul.f32 %v1195_v22, %v93_v21  ;;  %vm100_vm0 = vweird.f32 %v1195_v22 }
  0xbc   :  { %vm101_vm2 = vmor %vm99_vm1, %vm100_vm0 }
  0xbd   :  { %v96_v24 = vsub.f32 1.0, %v95_v23 }
  0xbf   :  { %v97_v25 = vmul.f32 %v1195_v22, %v96_v24 }
  0xc1   :  { %v98_v26 = vadd.f32 %v1195_v22, %v97_v25 }
  0xc3   :  { %v102_v29 = vsel %vm101_vm2, %v1195_v22, %v98_v26 }
  0xc4   :  { %v107_v32 = vsel %vm104_vm3, %v106_v30, %v102_v29 }
  0xc5   :  { %v110_v34 = vmul.f32 0.0, %v107_v32 }
 0x122   :  { %v113_v31 = vpop.permute.xlu0 %112 }
 0x123   :  { %v115_v33 = vmul.f32 %v113_v31, %v107_v32 }
 0x125   :  { %117 = vrot.lane.b32.xlu0 %v115_v33, %s1386_s1 }
 0x197   :  { %v118_v35 = vpop.permute.xlu0 %117 }
 0x198   :  { %v1414_v36 = vadd.f32 %v118_v35, %v110_v34 }
 0x19a   :  { %1196 = vtanh.f32 %v1414_v36 }
 0x1a0   :  { %v1197_v37 = vpop.eup %1196 }
 0x1a1   :  { %123 = vrot.lane.b32.xlu1 %v1197_v37, %s1385_s0 }
 0x213   :  { %v124_v42 = vpop.permute.xlu1 %123 }
 0x214   :  { %v126_v43 = vmul.f32 %v124_v42, %v107_v32 }
 0x216   :  { %128 = vrot.lane.b32.xlu1 %v126_v43, %s1386_s1 }
 0x288   :  { %v129_v44 = vpop.permute.xlu1 %128 }
 0x289   :  { %132 = vst.msk [vmem:[#allocation2] sm:$0xff] %vm131_vm4, %v129_v44  ;;  %1129 = vmatmul.msk.f32.vlgmr.msra.gmra.mxu1 %vm131_vm4, %v129_v44 }
 0x28a   :  { %531 = vmatpush.msra.mxu1 %v1418_v38 }
 0x28c   :  { %532 = vmatpush.msra.mxu1 %v1420_v39 }
 0x28e   :  { %533 = vmatpush.msra.mxu1 %v1424_v40 }
 0x290   :  { %534 = vmatpush.msra.mxu1 %v1430_v41 }
 0x306   :  { %v152_v46 = vpop.f32.mrf.mxu1 }
 0x307   :  { %v153_v47 = vadd.f32 %v1461_v45, %v152_v46 }
 0x309   :  { %1198 = vtanh.f32 %v153_v47  ;;  %v1130_v49 = vmul.f32 -1.442695, %v153_v47 }
 0x30b   :  { %1200 = vpow2.f32 %v1130_v49 }
 0x30f   :  { %v1199_v48 = vpop.eup %1198 }
 0x310   :  { %177 = vrot.lane.b32.xlu2 %v1199_v48, %s1385_s0 }
 0x311   :  { %v1201_v50 = vpop.eup %1200 }
 0x312   :  { %v158_v51 = vadd.f32 1.0, %v1201_v50 }
 0x314   :  { %1202 = vrcp.f32 %v158_v51  ;;  %v170_v57 = vand.u32 2147483648, %v158_v51  ;;  %vm164_vm6 = vweird.f32 %v158_v51  ;;  %v168_v58 = vand.u32 2147483647, %v158_v51 }
 0x316   :  { %v171_v60 = vor.u32 1.1754944e-38, %v170_v57  ;;  %vm169_vm8 = vcmp.eq.f32.partialorder %v168_v58, 8.507059e+37 }
 0x31a   :  { %v1203_v52 = vpop.eup %1202 }
 0x31b   :  { %v160_v53 = vmul.f32 %v1203_v52, %v158_v51  ;;  %vm165_vm5 = vweird.f32 %v1203_v52 }
 0x31c   :  { %vm166_vm7 = vmor %vm164_vm6, %vm165_vm5 }
 0x31d   :  { %v161_v54 = vsub.f32 1.0, %v160_v53 }
 0x31f   :  { %v162_v55 = vmul.f32 %v1203_v52, %v161_v54 }
 0x321   :  { %v163_v56 = vadd.f32 %v1203_v52, %v162_v55 }
 0x323   :  { %v167_v59 = vsel %vm166_vm7, %v1203_v52, %v163_v56 }
 0x324   :  { %v172_v62 = vsel %vm169_vm8, %v171_v60, %v167_v59 }
 0x325   :  { %v175_v0 = vmul.f32 %v172_v62, %v1414_v36 }
 0x36a   :  { %v178_v61 = vpop.permute.xlu2 %177 }
 0x36b   :  { %v180_v63 = vmul.f32 %v178_v61, %v172_v62 }
 0x36d   :  { %182 = vrot.lane.b32.xlu2 %v180_v63, %s1386_s1 }
 0x3c7   :  { %v183_v1 = vpop.permute.xlu2 %182 }
 0x3c8   :  { %v185_v2 = vadd.f32 %v183_v1, %v175_v0 }
 0x3ca   :  { %1204 = vtanh.f32 %v185_v2 }
 0x3d0   :  { %v1205_v3 = vpop.eup %1204 }
 0x3d1   :  { %188 = vrot.lane.b32.xlu0 %v1205_v3, %s1385_s0 }
 0x443   :  { %v189_v4 = vpop.permute.xlu0 %188 }
 0x444   :  { %v191_v5 = vmul.f32 %v189_v4, %v172_v62 }
 0x446   :  { %193 = vrot.lane.b32.xlu1 %v191_v5, %s1386_s1 }
 0x4b8   :  { %v194_v6 = vpop.permute.xlu1 %193 }
 0x4b9   :  { %196 = vst.msk [vmem:[#allocation2 + $0x8] sm:$0xff] %vm131_vm4, %v194_v6  ;;  %1131 = vmatmul.msk.f32.vlgmr.msra.gmra.mxu2 %vm131_vm4, %v194_v6 }
 0x4ba   :  { %595 = vmatpush.msra.mxu2 %v1418_v38 }
 0x4bc   :  { %596 = vmatpush.msra.mxu2 %v1420_v39 }
 0x4be   :  { %597 = vmatpush.msra.mxu2 %v1424_v40 }
 0x4c0   :  { %598 = vmatpush.msra.mxu2 %v1430_v41 }
 0x53c   :  { %v216_v7 = vpop.f32.mrf.mxu2 }
 0x53d   :  { %v217_v8 = vadd.f32 %v1461_v45, %v216_v7 }
 0x53f   :  { %1206 = vtanh.f32 %v217_v8  ;;  %v1132_v10 = vmul.f32 -1.442695, %v217_v8 }
 0x541   :  { %1208 = vpow2.f32 %v1132_v10 }
 0x545   :  { %v1207_v9 = vpop.eup %1206 }
 0x546   :  { %241 = vrot.lane.b32.xlu2 %v1207_v9, %s1385_s0 }
 0x547   :  { %v1209_v11 = vpop.eup %1208 }
 0x548   :  { %v222_v12 = vadd.f32 1.0, %v1209_v11 }
 0x54a   :  { %1210 = vrcp.f32 %v222_v12  ;;  %v234_v18 = vand.u32 2147483648, %v222_v12  ;;  %vm228_vm10 = vweird.f32 %v222_v12  ;;  %v232_v19 = vand.u32 2147483647, %v222_v12 }
 0x54c   :  { %v235_v21 = vor.u32 1.1754944e-38, %v234_v18  ;;  %vm233_vm12 = vcmp.eq.f32.partialorder %v232_v19, 8.507059e+37 }
 0x550   :  { %v1211_v13 = vpop.eup %1210 }
 0x551   :  { %v224_v14 = vmul.f32 %v1211_v13, %v222_v12  ;;  %vm229_vm9 = vweird.f32 %v1211_v13 }
 0x552   :  { %vm230_vm11 = vmor %vm228_vm10, %vm229_vm9 }
 0x553   :  { %v225_v15 = vsub.f32 1.0, %v224_v14 }
 0x555   :  { %v226_v16 = vmul.f32 %v1211_v13, %v225_v15 }
 0x557   :  { %v227_v17 = vadd.f32 %v1211_v13, %v226_v16 }
 0x559   :  { %v231_v20 = vsel %vm230_vm11, %v1211_v13, %v227_v17 }
 0x55a   :  { %v236_v23 = vsel %vm233_vm12, %v235_v21, %v231_v20 }
 0x55b   :  { %v239_v25 = vmul.f32 %v236_v23, %v185_v2 }
 0x5a0   :  { %v242_v22 = vpop.permute.xlu2 %241 }
 0x5a1   :  { %v244_v24 = vmul.f32 %v242_v22, %v236_v23 }
 0x5a3   :  { %246 = vrot.lane.b32.xlu0 %v244_v24, %s1386_s1 }
 0x615   :  { %v247_v26 = vpop.permute.xlu0 %246 }
 0x616   :  { %v249_v27 = vadd.f32 %v247_v26, %v239_v25 }
 0x618   :  { %1212 = vtanh.f32 %v249_v27 }
 0x61e   :  { %v1213_v28 = vpop.eup %1212 }
 0x61f   :  { %252 = vrot.lane.b32.xlu1 %v1213_v28, %s1385_s0 }
 0x691   :  { %v253_v29 = vpop.permute.xlu1 %252 }
 0x692   :  { %v255_v30 = vmul.f32 %v253_v29, %v236_v23 }
 0x694   :  { %257 = vrot.lane.b32.xlu2 %v255_v30, %s1386_s1 }
 0x6ee   :  { %v258_v31 = vpop.permute.xlu2 %257 }
 0x6ef   :  { %260 = vst.msk [vmem:[#allocation2 + $0x10] sm:$0xff] %vm131_vm4, %v258_v31  ;;  %1133 = vmatmul.msk.f32.vlgmr.msra.gmra.mxu3 %vm131_vm4, %v258_v31 }
 0x6f0   :  { %659 = vmatpush.msra.mxu3 %v1418_v38 }
 0x6f2   :  { %660 = vmatpush.msra.mxu3 %v1420_v39 }
 0x6f4   :  { %661 = vmatpush.msra.mxu3 %v1424_v40 }
 0x6f6   :  { %662 = vmatpush.msra.mxu3 %v1430_v41 }
 0x772   :  { %v280_v32 = vpop.f32.mrf.mxu3 }
 0x773   :  { %v281_v33 = vadd.f32 %v1461_v45, %v280_v32 }
 0x775   :  { %1214 = vtanh.f32 %v281_v33  ;;  %v1134_v35 = vmul.f32 -1.442695, %v281_v33 }
 0x777   :  { %1216 = vpow2.f32 %v1134_v35 }
 0x77b   :  { %v1215_v34 = vpop.eup %1214 }
 0x77c   :  { %305 = vrot.lane.b32.xlu0 %v1215_v34, %s1385_s0 }
 0x77d   :  { %v1217_v36 = vpop.eup %1216 }
 0x77e   :  { %v286_v37 = vadd.f32 1.0, %v1217_v36 }
 0x780   :  { %1218 = vrcp.f32 %v286_v37  ;;  %v298_v48 = vand.u32 2147483648, %v286_v37  ;;  %vm292_vm14 = vweird.f32 %v286_v37  ;;  %v296_v49 = vand.u32 2147483647, %v286_v37 }
 0x782   :  { %v299_v51 = vor.u32 1.1754944e-38, %v298_v48  ;;  %vm297_vm0 = vcmp.eq.f32.partialorder %v296_v49, 8.507059e+37 }
 0x786   :  { %v1219_v42 = vpop.eup %1218 }
 0x787   :  { %v288_v43 = vmul.f32 %v1219_v42, %v286_v37  ;;  %vm293_vm13 = vweird.f32 %v1219_v42 }
 0x788   :  { %vm294_vm15 = vmor %vm292_vm14, %vm293_vm13 }
 0x789   :  { %v289_v44 = vsub.f32 1.0, %v288_v43 }
 0x78b   :  { %v290_v46 = vmul.f32 %v1219_v42, %v289_v44 }
 0x78d   :  { %v291_v47 = vadd.f32 %v1219_v42, %v290_v46 }
 0x78f   :  { %v295_v50 = vsel %vm294_vm15, %v1219_v42, %v291_v47 }
 0x790   :  { %v300_v53 = vsel %vm297_vm0, %v299_v51, %v295_v50 }
 0x791   :  { %v303_v55 = vmul.f32 %v300_v53, %v249_v27 }
 0x7ee   :  { %v306_v52 = vpop.permute.xlu0 %305 }
 0x7ef   :  { %v308_v54 = vmul.f32 %v306_v52, %v300_v53 }
 0x7f1   :  { %310 = vrot.lane.b32.xlu1 %v308_v54, %s1386_s1 }
 0x863   :  { %v311_v56 = vpop.permute.xlu1 %310 }
 0x864   :  { %v313_v57 = vadd.f32 %v311_v56, %v303_v55 }
 0x866   :  { %1220 = vtanh.f32 %v313_v57 }
 0x86c   :  { %v1221_v58 = vpop.eup %1220 }
 0x86d   :  { %316 = vrot.lane.b32.xlu2 %v1221_v58, %s1385_s0 }
 0x8c7   :  { %v317_v59 = vpop.permute.xlu2 %316 }
 0x8c8   :  { %v319_v60 = vmul.f32 %v317_v59, %v300_v53 }
 0x8ca   :  { %321 = vrot.lane.b32.xlu0 %v319_v60, %s1386_s1 }
 0x93c   :  { %v322_v61 = vpop.permute.xlu0 %321 }
 0x93d   :  { %324 = vst.msk [vmem:[#allocation2 + $0x18] sm:$0xff] %vm131_vm4, %v322_v61  ;;  %1135 = vmatmul.msk.f32.vlgmr.msrb.gmra.mxu1 %vm131_vm4, %v322_v61 }
 0x93e   :  { %723 = vmatpush.msrb.mxu1 %v1418_v38 }
 0x940   :  { %724 = vmatpush.msrb.mxu1 %v1420_v39 }
 0x942   :  { %725 = vmatpush.msrb.mxu1 %v1424_v40 }
 0x944   :  { %726 = vmatpush.msrb.mxu1 %v1430_v41 }
 0x9ba   :  { %v344_v62 = vpop.f32.mrf.mxu1 }
 0x9bb   :  { %v345_v63 = vadd.f32 %v1461_v45, %v344_v62 }
 0x9bd   :  { %1222 = vtanh.f32 %v345_v63  ;;  %v1136_v1 = vmul.f32 -1.442695, %v345_v63 }
 0x9bf   :  { %1224 = vpow2.f32 %v1136_v1 }
 0x9c3   :  { %v1223_v0 = vpop.eup %1222 }
 0x9c4   :  { %369 = vrot.lane.b32.xlu1 %v1223_v0, %s1385_s0 }
 0x9c5   :  { %v1225_v2 = vpop.eup %1224 }
 0x9c6   :  { %v350_v3 = vadd.f32 1.0, %v1225_v2 }
 0x9c8   :  { %1226 = vrcp.f32 %v350_v3  ;;  %v362_v9 = vand.u32 2147483648, %v350_v3  ;;  %vm356_vm2 = vweird.f32 %v350_v3  ;;  %v360_v10 = vand.u32 2147483647, %v350_v3 }
 0x9ca   :  { %v363_v12 = vor.u32 1.1754944e-38, %v362_v9  ;;  %vm361_vm5 = vcmp.eq.f32.partialorder %v360_v10, 8.507059e+37 }
 0x9ce   :  { %v1227_v4 = vpop.eup %1226 }
 0x9cf   :  { %v352_v5 = vmul.f32 %v1227_v4, %v350_v3  ;;  %vm357_vm1 = vweird.f32 %v1227_v4 }
 0x9d0   :  { %vm358_vm3 = vmor %vm356_vm2, %vm357_vm1 }
 0x9d1   :  { %v353_v6 = vsub.f32 1.0, %v352_v5 }
 0x9d3   :  { %v354_v7 = vmul.f32 %v1227_v4, %v353_v6 }
 0x9d5   :  { %v355_v8 = vadd.f32 %v1227_v4, %v354_v7 }
 0x9d7   :  { %v359_v11 = vsel %vm358_vm3, %v1227_v4, %v355_v8 }
 0x9d8   :  { %v364_v14 = vsel %vm361_vm5, %v363_v12, %v359_v11 }
 0x9d9   :  { %v367_v16 = vmul.f32 %v364_v14, %v313_v57 }
 0xa36   :  { %v370_v13 = vpop.permute.xlu1 %369 }
 0xa37   :  { %v372_v15 = vmul.f32 %v370_v13, %v364_v14 }
 0xa39   :  { %374 = vrot.lane.b32.xlu2 %v372_v15, %s1386_s1 }
 0xa93   :  { %v375_v17 = vpop.permute.xlu2 %374 }
 0xa94   :  { %v377_v18 = vadd.f32 %v375_v17, %v367_v16 }
 0xa96   :  { %1228 = vtanh.f32 %v377_v18 }
 0xa9c   :  { %v1229_v19 = vpop.eup %1228 }
 0xa9d   :  { %380 = vrot.lane.b32.xlu0 %v1229_v19, %s1385_s0 }
 0xb0f   :  { %v381_v20 = vpop.permute.xlu0 %380 }
 0xb10   :  { %v383_v21 = vmul.f32 %v381_v20, %v364_v14 }
 0xb12   :  { %385 = vrot.lane.b32.xlu1 %v383_v21, %s1386_s1 }
 0xb84   :  { %v386_v22 = vpop.permute.xlu1 %385 }
 0xb85   :  { %388 = vst.msk [vmem:[#allocation2 + $0x20] sm:$0xff] %vm131_vm4, %v386_v22  ;;  %1137 = vmatmul.msk.f32.vlgmr.msrb.gmra.mxu2 %vm131_vm4, %v386_v22 }
 0xb86   :  { %787 = vmatpush.msrb.mxu2 %v1418_v38 }
 0xb88   :  { %788 = vmatpush.msrb.mxu2 %v1420_v39 }
 0xb8a   :  { %789 = vmatpush.msrb.mxu2 %v1424_v40 }
 0xb8c   :  { %790 = vmatpush.msrb.mxu2 %v1430_v41 }
 0xc08   :  { %v408_v23 = vpop.f32.mrf.mxu2 }
 0xc09   :  { %v409_v24 = vadd.f32 %v1461_v45, %v408_v23 }
 0xc0b   :  { %1230 = vtanh.f32 %v409_v24  ;;  %v1138_v26 = vmul.f32 -1.442695, %v409_v24 }
 0xc0d   :  { %1232 = vpow2.f32 %v1138_v26 }
 0xc11   :  { %v1231_v25 = vpop.eup %1230 }
 0xc12   :  { %433 = vrot.lane.b32.xlu2 %v1231_v25, %s1385_s0 }
 0xc13   :  { %v1233_v27 = vpop.eup %1232 }
 0xc14   :  { %v414_v28 = vadd.f32 1.0, %v1233_v27 }
 0xc16   :  { %1234 = vrcp.f32 %v414_v28  ;;  %v426_v34 = vand.u32 2147483648, %v414_v28  ;;  %vm420_vm7 = vweird.f32 %v414_v28  ;;  %v424_v35 = vand.u32 2147483647, %v414_v28 }
 0xc18   :  { %v427_v37 = vor.u32 1.1754944e-38, %v426_v34  ;;  %vm425_vm9 = vcmp.eq.f32.partialorder %v424_v35, 8.507059e+37 }
 0xc1c   :  { %v1235_v29 = vpop.eup %1234 }
 0xc1d   :  { %v416_v30 = vmul.f32 %v1235_v29, %v414_v28  ;;  %vm421_vm6 = vweird.f32 %v1235_v29 }
 0xc1e   :  { %vm422_vm8 = vmor %vm420_vm7, %vm421_vm6 }
 0xc1f   :  { %v417_v31 = vsub.f32 1.0, %v416_v30 }
 0xc21   :  { %v418_v32 = vmul.f32 %v1235_v29, %v417_v31 }
 0xc23   :  { %v419_v33 = vadd.f32 %v1235_v29, %v418_v32 }
 0xc25   :  { %v423_v36 = vsel %vm422_vm8, %v1235_v29, %v419_v33 }
 0xc26   :  { %v428_v43 = vsel %vm425_vm9, %v427_v37, %v423_v36 }
 0xc27   :  { %v431_v46 = vmul.f32 %v428_v43, %v377_v18 }
 0xc6c   :  { %v434_v42 = vpop.permute.xlu2 %433 }
 0xc6d   :  { %v436_v44 = vmul.f32 %v434_v42, %v428_v43 }
 0xc6f   :  { %438 = vrot.lane.b32.xlu0 %v436_v44, %s1386_s1 }
 0xce1   :  { %v439_v47 = vpop.permute.xlu0 %438 }
 0xce2   :  { %v441_v48 = vadd.f32 %v439_v47, %v431_v46 }
 0xce4   :  { %1236 = vtanh.f32 %v441_v48 }
 0xcea   :  { %v1237_v49 = vpop.eup %1236 }
 0xceb   :  { %444 = vrot.lane.b32.xlu1 %v1237_v49, %s1385_s0 }
 0xd5d   :  { %v445_v50 = vpop.permute.xlu1 %444 }
 0xd5e   :  { %v447_v51 = vmul.f32 %v445_v50, %v428_v43 }
 0xd60   :  { %449 = vrot.lane.b32.xlu2 %v447_v51, %s1386_s1 }
 0xdba   :  { %v450_v52 = vpop.permute.xlu2 %449 }
 0xdbb   :  { %452 = vst.msk [vmem:[#allocation2 + $0x28] sm:$0xff] %vm131_vm4, %v450_v52  ;;  %1139 = vmatmul.msk.f32.vlgmr.msrb.gmra.mxu3 %vm131_vm4, %v450_v52 }
 0xdbc   :  { %851 = vmatpush.msrb.mxu3 %v1418_v38 }
 0xdbe   :  { %852 = vmatpush.msrb.mxu3 %v1420_v39 }
 0xdc0   :  { %853 = vmatpush.msrb.mxu3 %v1424_v40 }
 0xdc2   :  { %854 = vmatpush.msrb.mxu3 %v1430_v41 }
 0xe3e   :  { %v472_v53 = vpop.f32.mrf.mxu3 }
 0xe3f   :  { %v473_v54 = vadd.f32 %v1461_v45, %v472_v53 }
 0xe41   :  { %1238 = vtanh.f32 %v473_v54  ;;  %v1140_v56 = vmul.f32 -1.442695, %v473_v54 }
 0xe43   :  { %1240 = vpow2.f32 %v1140_v56 }
 0xe47   :  { %v1239_v55 = vpop.eup %1238 }
 0xe48   :  { %497 = vrot.lane.b32.xlu0 %v1239_v55, %s1385_s0 }
 0xe49   :  { %v1241_v57 = vpop.eup %1240 }
 0xe4a   :  { %v478_v58 = vadd.f32 1.0, %v1241_v57 }
 0xe4c   :  { %1242 = vrcp.f32 %v478_v58  ;;  %v490_v40 = vand.u32 2147483648, %v478_v58  ;;  %vm484_vm11 = vweird.f32 %v478_v58  ;;  %v488_v41 = vand.u32 2147483647, %v478_v58 }
 0xe4e   :  { %v491_v63 = vor.u32 1.1754944e-38, %v490_v40  ;;  %vm489_vm13 = vcmp.eq.f32.partialorder %v488_v41, 8.507059e+37 }
 0xe52   :  { %v1243_v59 = vpop.eup %1242 }
 0xe53   :  { %v480_v38 = vmul.f32 %v1243_v59, %v478_v58  ;;  %vm485_vm10 = vweird.f32 %v1243_v59 }
 0xe54   :  { %vm486_vm12 = vmor %vm484_vm11, %vm485_vm10 }
 0xe55   :  { %v481_v60 = vsub.f32 1.0, %v480_v38 }
 0xe57   :  { %v482_v39 = vmul.f32 %v1243_v59, %v481_v60 }
 0xe59   :  { %v483_v61 = vadd.f32 %v1243_v59, %v482_v39 }
 0xe5b   :  { %v487_v62 = vsel %vm486_vm12, %v1243_v59, %v483_v61 }
 0xe5c   :  { %v492_v1 = vsel %vm489_vm13, %v491_v63, %v487_v62 }
 0xe5d   :  { %v495_v3 = vmul.f32 %v492_v1, %v441_v48 }
 0xeba   :  { %v498_v0 = vpop.permute.xlu0 %497 }
 0xebb   :  { %v500_v2 = vmul.f32 %v498_v0, %v492_v1 }
 0xebd   :  { %502 = vrot.lane.b32.xlu1 %v500_v2, %s1386_s1 }
 0xf2f   :  { %v503_v4 = vpop.permute.xlu1 %502 }
 0xf30   :  { %v505_v5 = vadd.f32 %v503_v4, %v495_v3 }
 0xf32   :  { %1244 = vtanh.f32 %v505_v5 }
 0xf38   :  { %v1245_v6 = vpop.eup %1244 }
 0xf39   :  { %508 = vrot.lane.b32.xlu2 %v1245_v6, %s1385_s0 }
 0xf93   :  { %v509_v7 = vpop.permute.xlu2 %508 }
 0xf94   :  { %v511_v8 = vmul.f32 %v509_v7, %v492_v1 }
 0xf96   :  { %513 = vrot.lane.b32.xlu0 %v511_v8, %s1386_s1 }
0x1008   :  { %v514_v9 = vpop.permute.xlu0 %513 }
0x1009   :  { %516 = vst.msk [vmem:[#allocation2 + $0x30] sm:$0xff] %vm131_vm4, %v514_v9  ;;  %1141 = vmatmul.msk.f32.vlgmr.msra.gmra.mxu1 %vm131_vm4, %v514_v9 }
0x1086   :  { %v536_v10 = vpop.f32.mrf.mxu1 }
0x1087   :  { %v537_v11 = vadd.f32 %v1461_v45, %v536_v10 }
0x1089   :  { %1246 = vtanh.f32 %v537_v11  ;;  %v1142_v13 = vmul.f32 -1.442695, %v537_v11 }
0x108b   :  { %1248 = vpow2.f32 %v1142_v13 }
0x108f   :  { %v1247_v12 = vpop.eup %1246 }
0x1090   :  { %561 = vrot.lane.b32.xlu1 %v1247_v12, %s1385_s0 }
0x1091   :  { %v1249_v14 = vpop.eup %1248 }
0x1092   :  { %v542_v15 = vadd.f32 1.0, %v1249_v14 }
0x1094   :  { %1250 = vrcp.f32 %v542_v15  ;;  %v554_v21 = vand.u32 2147483648, %v542_v15  ;;  %vm548_vm15 = vweird.f32 %v542_v15  ;;  %v552_v22 = vand.u32 2147483647, %v542_v15 }
0x1096   :  { %v555_v24 = vor.u32 1.1754944e-38, %v554_v21  ;;  %vm553_vm1 = vcmp.eq.f32.partialorder %v552_v22, 8.507059e+37  ;;  %v65_v21 = vld [vmem:[#allocation6 + $0xb8] sm:$0xff]  ;;  %v64_v22 = vld [vmem:[#allocation6 + $0xb0] sm:$0xff] }
0x1097   :  { %1169 = vmatpush.msra.mxu1 %v65_v21  ;;  %1034 = vmatpush.msra.mxu0 %v65_v21 }
0x1099   :  { %1172 = vmatpush.msra.mxu1 %v64_v22  ;;  %1035 = vmatpush.msra.mxu0 %v64_v22 }
0x109a   :  { %v1251_v16 = vpop.eup %1250 }
0x109b   :  { %v544_v17 = vmul.f32 %v1251_v16, %v542_v15  ;;  %vm549_vm14 = vweird.f32 %v1251_v16 }
0x109c   :  { %vm550_vm0 = vmor %vm548_vm15, %vm549_vm14 }
0x109d   :  { %v545_v18 = vsub.f32 1.0, %v544_v17 }
0x109f   :  { %v546_v19 = vmul.f32 %v1251_v16, %v545_v18 }
0x10a1   :  { %v547_v20 = vadd.f32 %v1251_v16, %v546_v19 }
0x10a3   :  { %v551_v23 = vsel %vm550_vm0, %v1251_v16, %v547_v20 }
0x10a4   :  { %v556_v26 = vsel %vm553_vm1, %v555_v24, %v551_v23  ;;  %v63_v23 = vld [vmem:[#allocation6 + $0xa8] sm:$0xff]  ;;  %v62_v24 = vld [vmem:[#allocation6 + $0xa0] sm:$0xff] }
0x10a5   :  { %v559_v28 = vmul.f32 %v556_v26, %v505_v5  ;;  %1175 = vmatpush.msra.mxu1 %v63_v23  ;;  %1036 = vmatpush.msra.mxu0 %v63_v23 }
0x10a7   :  { %1178 = vmatpush.msra.mxu1 %v62_v24  ;;  %1037 = vmatpush.msra.mxu0 %v62_v24 }
0x1102   :  { %v562_v25 = vpop.permute.xlu1 %561 }
0x1103   :  { %v564_v27 = vmul.f32 %v562_v25, %v556_v26 }
0x1105   :  { %566 = vrot.lane.b32.xlu2 %v564_v27, %s1386_s1  ;;  %v968_v27 = vld [vmem:[#allocation2 + $0x18] sm:$0xff] }
0x115f   :  { %v567_v29 = vpop.permute.xlu2 %566 }
0x1160   :  { %v569_v30 = vadd.f32 %v567_v29, %v559_v28  ;;  %v969_v28 = vld [vmem:[#allocation2 + $0x20] sm:$0xff]  ;;  %v970_v29 = vld [vmem:[#allocation2 + $0x28] sm:$0xff] }
0x1162   :  { %1252 = vtanh.f32 %v569_v30 }
0x1168   :  { %v1253_v31 = vpop.eup %1252 }
0x1169   :  { %572 = vrot.lane.b32.xlu0 %v1253_v31, %s1385_s0 }
0x11db   :  { %v573_v32 = vpop.permute.xlu0 %572 }
0x11dc   :  { %v575_v33 = vmul.f32 %v573_v32, %v556_v26  ;;  %v967_v26 = vld [vmem:[#allocation2 + $0x10] sm:$0xff]  ;;  %v1555_v32 = vld [vmem:[#allocation6 + $0xc1] ss:$0 sm:$0xff] }
0x11de   :  { %577 = vrot.lane.b32.xlu1 %v575_v33, %s1386_s1 }
0x1250   :  { %v578_v34 = vpop.permute.xlu1 %577 }
0x1251   :  { %580 = vst.msk [vmem:[#allocation2 + $0x38] sm:$0xff] %vm131_vm4, %v578_v34  ;;  %1143 = vmatmul.msk.f32.vlgmr.msra.gmra.mxu2 %vm131_vm4, %v578_v34 }
0x1252   :  { %1170 = vmatpush.msra.mxu2 %v65_v21 }
0x1254   :  { %1173 = vmatpush.msra.mxu2 %v64_v22 }
0x1256   :  { %1176 = vmatpush.msra.mxu2 %v63_v23 }
0x1258   :  { %1179 = vmatpush.msra.mxu2 %v62_v24 }
0x12d4   :  { %v600_v35 = vpop.f32.mrf.mxu2 }
0x12d5   :  { %v601_v36 = vadd.f32 %v1461_v45, %v600_v35 }
0x12d7   :  { %1254 = vtanh.f32 %v601_v36  ;;  %v1144_v42 = vmul.f32 -1.442695, %v601_v36 }
0x12d9   :  { %1256 = vpow2.f32 %v1144_v42 }
0x12dd   :  { %v1255_v37 = vpop.eup %1254 }
0x12de   :  { %625 = vrot.lane.b32.xlu2 %v1255_v37, %s1385_s0 }
0x12df   :  { %v1257_v43 = vpop.eup %1256 }
0x12e0   :  { %v606_v44 = vadd.f32 1.0, %v1257_v43 }
0x12e2   :  { %1258 = vrcp.f32 %v606_v44  ;;  %v618_v51 = vand.u32 2147483648, %v606_v44  ;;  %vm612_vm3 = vweird.f32 %v606_v44  ;;  %v616_v52 = vand.u32 2147483647, %v606_v44 }
0x12e4   :  { %v619_v54 = vor.u32 1.1754944e-38, %v618_v51  ;;  %vm617_vm6 = vcmp.eq.f32.partialorder %v616_v52, 8.507059e+37 }
0x12e8   :  { %v1259_v46 = vpop.eup %1258 }
0x12e9   :  { %v608_v47 = vmul.f32 %v1259_v46, %v606_v44  ;;  %vm613_vm2 = vweird.f32 %v1259_v46 }
0x12ea   :  { %vm614_vm5 = vmor %vm612_vm3, %vm613_vm2 }
0x12eb   :  { %v609_v48 = vsub.f32 1.0, %v608_v47 }
0x12ed   :  { %v610_v49 = vmul.f32 %v1259_v46, %v609_v48 }
0x12ef   :  { %v611_v50 = vadd.f32 %v1259_v46, %v610_v49 }
0x12f1   :  { %v615_v53 = vsel %vm614_vm5, %v1259_v46, %v611_v50 }
0x12f2   :  { %v620_v56 = vsel %vm617_vm6, %v619_v54, %v615_v53 }
0x12f3   :  { %v623_v58 = vmul.f32 %v620_v56, %v569_v30 }
0x1338   :  { %v626_v55 = vpop.permute.xlu2 %625 }
0x1339   :  { %v628_v57 = vmul.f32 %v626_v55, %v620_v56 }
0x133b   :  { %630 = vrot.lane.b32.xlu0 %v628_v57, %s1386_s1 }
0x13ad   :  { %v631_v59 = vpop.permute.xlu0 %630 }
0x13ae   :  { %v633_v38 = vadd.f32 %v631_v59, %v623_v58 }
0x13b0   :  { %1260 = vtanh.f32 %v633_v38 }
0x13b6   :  { %v1261_v60 = vpop.eup %1260 }
0x13b7   :  { %636 = vrot.lane.b32.xlu1 %v1261_v60, %s1385_s0 }
0x1429   :  { %v637_v39 = vpop.permute.xlu1 %636 }
0x142a   :  { %v639_v61 = vmul.f32 %v637_v39, %v620_v56 }
0x142c   :  { %641 = vrot.lane.b32.xlu2 %v639_v61, %s1386_s1 }
0x1486   :  { %v642_v40 = vpop.permute.xlu2 %641 }
0x1487   :  { %644 = vst.msk [vmem:[#allocation2 + $0x40] sm:$0xff] %vm131_vm4, %v642_v40  ;;  %1145 = vmatmul.msk.f32.vlgmr.msra.gmra.mxu3 %vm131_vm4, %v642_v40 }
0x1488   :  { %1171 = vmatpush.msra.mxu3 %v65_v21 }
0x148a   :  { %1174 = vmatpush.msra.mxu3 %v64_v22 }
0x148c   :  { %1177 = vmatpush.msra.mxu3 %v63_v23 }
0x148e   :  { %1180 = vmatpush.msra.mxu3 %v62_v24 }
0x150a   :  { %v664_v41 = vpop.f32.mrf.mxu3 }
0x150b   :  { %v665_v62 = vadd.f32 %v1461_v45, %v664_v41 }
0x150d   :  { %1262 = vtanh.f32 %v665_v62  ;;  %v1146_v0 = vmul.f32 -1.442695, %v665_v62 }
0x150f   :  { %1264 = vpow2.f32 %v1146_v0 }
0x1513   :  { %v1263_v63 = vpop.eup %1262 }
0x1514   :  { %689 = vrot.lane.b32.xlu0 %v1263_v63, %s1385_s0 }
0x1515   :  { %v1265_v1 = vpop.eup %1264 }
0x1516   :  { %v670_v2 = vadd.f32 1.0, %v1265_v1  ;;  %v971_v1 = vld [vmem:[#allocation2 + $0x30] sm:$0xff] }
0x1518   :  { %1266 = vrcp.f32 %v670_v2  ;;  %v682_v8 = vand.u32 2147483648, %v670_v2  ;;  %vm676_vm8 = vweird.f32 %v670_v2  ;;  %v680_v9 = vand.u32 2147483647, %v670_v2 }
0x151a   :  { %v683_v11 = vor.u32 1.1754944e-38, %v682_v8  ;;  %vm681_vm10 = vcmp.eq.f32.partialorder %v680_v9, 8.507059e+37 }
0x151e   :  { %v1267_v3 = vpop.eup %1266 }
0x151f   :  { %v672_v4 = vmul.f32 %v1267_v3, %v670_v2  ;;  %vm677_vm7 = vweird.f32 %v1267_v3  ;;  %v972_v2 = vld [vmem:[#allocation2 + $0x38] sm:$0xff] }
0x1520   :  { %vm678_vm9 = vmor %vm676_vm8, %vm677_vm7 }
0x1521   :  { %v673_v5 = vsub.f32 1.0, %v672_v4 }
0x1523   :  { %v674_v6 = vmul.f32 %v1267_v3, %v673_v5 }
0x1525   :  { %v675_v7 = vadd.f32 %v1267_v3, %v674_v6 }
0x1527   :  { %v679_v10 = vsel %vm678_vm9, %v1267_v3, %v675_v7  ;;  %v973_v3 = vld [vmem:[#allocation2 + $0x40] sm:$0xff] }
0x1528   :  { %v684_v13 = vsel %vm681_vm10, %v683_v11, %v679_v10 }
0x1529   :  { %v687_v15 = vmul.f32 %v684_v13, %v633_v38 }
0x1586   :  { %v690_v12 = vpop.permute.xlu0 %689 }
0x1587   :  { %v692_v14 = vmul.f32 %v690_v12, %v684_v13 }
0x1589   :  { %694 = vrot.lane.b32.xlu1 %v692_v14, %s1386_s1 }
0x15fb   :  { %v695_v16 = vpop.permute.xlu1 %694 }
0x15fc   :  { %v1543_v17 = vadd.f32 %v695_v16, %v687_v15 }
0x15fe   :  { %1268 = vtanh.f32 %v1543_v17 }
0x1604   :  { %v1269_v18 = vpop.eup %1268 }
0x1605   :  { %700 = vrot.lane.b32.xlu2 %v1269_v18, %s1385_s0 }
0x165f   :  { %v701_v19 = vpop.permute.xlu2 %700 }
0x1660   :  { %v703_v20 = vmul.f32 %v701_v19, %v684_v13 }
0x1662   :  { %705 = vrot.lane.b32.xlu0 %v703_v20, %s1386_s1 }
0x16d4   :  { %v706_v25 = vpop.permute.xlu0 %705 }
0x16d5   :  { %708 = vst.msk [vmem:[#allocation2 + $0x48] sm:$0xff] %vm131_vm4, %v706_v25  ;;  %1147 = vmatmul.msk.f32.vlgmr.msrb.gmra.mxu1 %vm131_vm4, %v706_v25 }
0x16dc   :  { %v974_v4 = vld [vmem:[#allocation2 + $0x48] sm:$0xff] }
0x16dd   :  { %1157 = vmatmul.msk.f32.vlgmr.msra.gmra.mxu1 %vm131_vm4, %v967_v26 }
0x16e5   :  { %1158 = vmatmul.msk.f32.gmra.mxu1 %vm131_vm4, %v968_v27 }
0x16ed   :  { %1159 = vmatmul.msk.f32.gmra.mxu1 %vm131_vm4, %v969_v28 }
0x16f5   :  { %1160 = vmatmul.msk.f32.gmra.mxu1 %vm131_vm4, %v970_v29 }
0x1752   :  { %v728_v30 = vpop.f32.mrf.mxu1 }
0x1753   :  { %v729_v31 = vadd.f32 %v1461_v45, %v728_v30 }
0x1755   :  { %1270 = vtanh.f32 %v729_v31  ;;  %v1148_v47 = vmul.f32 -1.442695, %v729_v31 }
0x1757   :  { %1272 = vpow2.f32 %v1148_v47 }
0x175a   :  { %v1045_v33 = vpop.f32.mrf.mxu1 }
0x175b   :  { %v1271_v34 = vpop.eup %1270  ;;  %v1046_v35 = vadd.f32 %v1555_v32, %v1045_v33 }
0x175c   :  { %753 = vrot.lane.b32.xlu1 %v1271_v34, %s1385_s0 }
0x175d   :  { %1085 = vst [vmem:[#allocation8 + $0x10] sm:$0xff] %v1046_v35  ;;  %v1273_v48 = vpop.eup %1272 }
0x175e   :  { %v734_v49 = vadd.f32 1.0, %v1273_v48 }
0x1760   :  { %1274 = vrcp.f32 %v734_v49  ;;  %v746_v55 = vand.u32 2147483648, %v734_v49  ;;  %vm740_vm12 = vweird.f32 %v734_v49  ;;  %v744_v56 = vand.u32 2147483647, %v734_v49 }
0x1762   :  { %v1048_v36 = vpop.f32.mrf.mxu1  ;;  %v747_v58 = vor.u32 1.1754944e-38, %v746_v55  ;;  %vm745_vm14 = vcmp.eq.f32.partialorder %v744_v56, 8.507059e+37 }
0x1763   :  { %v1049_v37 = vadd.f32 %v1555_v32, %v1048_v36 }
0x1765   :  { %1087 = vst [vmem:[#allocation8 + $0x18] sm:$0xff] %v1049_v37 }
0x1766   :  { %v1275_v50 = vpop.eup %1274 }
0x1767   :  { %v736_v51 = vmul.f32 %v1275_v50, %v734_v49  ;;  %vm741_vm11 = vweird.f32 %v1275_v50 }
0x1768   :  { %vm742_vm13 = vmor %vm740_vm12, %vm741_vm11 }
0x1769   :  { %v737_v52 = vsub.f32 1.0, %v736_v51 }
0x176a   :  { %v1051_v42 = vpop.f32.mrf.mxu1 }
0x176b   :  { %v1052_v43 = vadd.f32 %v1555_v32, %v1051_v42  ;;  %v738_v53 = vmul.f32 %v1275_v50, %v737_v52 }
0x176d   :  { %1089 = vst [vmem:[#allocation8 + $0x20] sm:$0xff] %v1052_v43  ;;  %v739_v54 = vadd.f32 %v1275_v50, %v738_v53 }
0x176f   :  { %v743_v57 = vsel %vm742_vm13, %v1275_v50, %v739_v54 }
0x1770   :  { %v748_v38 = vsel %vm745_vm14, %v747_v58, %v743_v57 }
0x1771   :  { %v751_v39 = vmul.f32 %v748_v38, %v1543_v17 }
0x1772   :  { %v1054_v44 = vpop.f32.mrf.mxu1 }
0x1773   :  { %v1055_v46 = vadd.f32 %v1555_v32, %v1054_v44 }
0x1775   :  { %1091 = vst [vmem:[#allocation8 + $0x28] sm:$0xff] %v1055_v46  ;;  %v1302_v46 = vld [vmem:[#allocation6 + $0xc0] ss:$0 sm:$0xff] }
0x17ce   :  { %v754_v59 = vpop.permute.xlu1 %753 }
0x17cf   :  { %v756_v60 = vmul.f32 %v754_v59, %v748_v38 }
0x17d1   :  { %758 = vrot.lane.b32.xlu2 %v756_v60, %s1386_s1 }
0x182b   :  { %v759_v61 = vpop.permute.xlu2 %758 }
0x182c   :  { %v761_v40 = vadd.f32 %v759_v61, %v751_v39 }
0x182e   :  { %1276 = vtanh.f32 %v761_v40 }
0x1834   :  { %v1277_v41 = vpop.eup %1276 }
0x1835   :  { %764 = vrot.lane.b32.xlu0 %v1277_v41, %s1385_s0 }
0x18a7   :  { %v765_v62 = vpop.permute.xlu0 %764 }
0x18a8   :  { %v767_v63 = vmul.f32 %v765_v62, %v748_v38 }
0x18aa   :  { %769 = vrot.lane.b32.xlu1 %v767_v63, %s1386_s1 }
0x191c   :  { %v770_v0 = vpop.permute.xlu1 %769 }
0x191d   :  { %772 = vst.msk [vmem:[#allocation2 + $0x50] sm:$0xff] %vm131_vm4, %v770_v0  ;;  %1149 = vmatmul.msk.f32.vlgmr.msrb.gmra.mxu2 %vm131_vm4, %v770_v0 }
0x1924   :  { %v975_v42 = vld [vmem:[#allocation2 + $0x50] sm:$0xff] }
0x1925   :  { %1161 = vmatmul.msk.f32.vlgmr.msra.gmra.mxu2 %vm131_vm4, %v971_v1 }
0x192d   :  { %1162 = vmatmul.msk.f32.gmra.mxu2 %vm131_vm4, %v972_v2 }
0x1935   :  { %1163 = vmatmul.msk.f32.gmra.mxu2 %vm131_vm4, %v973_v3 }
0x193d   :  { %1164 = vmatmul.msk.f32.gmra.mxu2 %vm131_vm4, %v974_v4 }
0x19a0   :  { %v792_v5 = vpop.f32.mrf.mxu2 }
0x19a1   :  { %v793_v6 = vadd.f32 %v1461_v45, %v792_v5 }
0x19a3   :  { %1278 = vtanh.f32 %v793_v6  ;;  %v1150_v45 = vmul.f32 -1.442695, %v793_v6 }
0x19a5   :  { %1280 = vpow2.f32 %v1150_v45 }
0x19a8   :  { %v1057_v7 = vpop.f32.mrf.mxu2 }
0x19a9   :  { %v1279_v8 = vpop.eup %1278  ;;  %v1058_v9 = vadd.f32 %v1555_v32, %v1057_v7  ;;  %v965_v7 = vld [vmem:[#allocation2] sm:$0xff] }
0x19aa   :  { %817 = vrot.lane.b32.xlu2 %v1279_v8, %s1385_s0 }
0x19ab   :  { %1093 = vst [vmem:[#allocation8 + $0x30] sm:$0xff] %v1058_v9  ;;  %v1281_v16 = vpop.eup %1280  ;;  %v966_v9 = vld [vmem:[#allocation2 + $0x8] sm:$0xff] }
0x19ac   :  { %v798_v17 = vadd.f32 1.0, %v1281_v16 }
0x19ae   :  { %1282 = vrcp.f32 %v798_v17  ;;  %v810_v23 = vand.u32 2147483648, %v798_v17  ;;  %vm804_vm0 = vweird.f32 %v798_v17  ;;  %v808_v24 = vand.u32 2147483647, %v798_v17 }
0x19b0   :  { %v1060_v10 = vpop.f32.mrf.mxu2  ;;  %v811_v26 = vor.u32 1.1754944e-38, %v810_v23  ;;  %vm809_vm2 = vcmp.eq.f32.partialorder %v808_v24, 8.507059e+37 }
0x19b1   :  { %v1061_v11 = vadd.f32 %v1555_v32, %v1060_v10 }
0x19b3   :  { %1095 = vst [vmem:[#allocation8 + $0x38] sm:$0xff] %v1061_v11 }
0x19b4   :  { %v1283_v18 = vpop.eup %1282 }
0x19b5   :  { %v800_v19 = vmul.f32 %v1283_v18, %v798_v17  ;;  %vm805_vm15 = vweird.f32 %v1283_v18 }
0x19b6   :  { %vm806_vm1 = vmor %vm804_vm0, %vm805_vm15 }
0x19b7   :  { %v801_v20 = vsub.f32 1.0, %v800_v19 }
0x19b8   :  { %v1063_v12 = vpop.f32.mrf.mxu2 }
0x19b9   :  { %v1064_v13 = vadd.f32 %v1555_v32, %v1063_v12  ;;  %v802_v21 = vmul.f32 %v1283_v18, %v801_v20 }
0x19bb   :  { %1097 = vst [vmem:[#allocation8 + $0x40] sm:$0xff] %v1064_v13  ;;  %v803_v22 = vadd.f32 %v1283_v18, %v802_v21 }
0x19bd   :  { %v807_v25 = vsel %vm806_vm1, %v1283_v18, %v803_v22 }
0x19be   :  { %v812_v28 = vsel %vm809_vm2, %v811_v26, %v807_v25 }
0x19bf   :  { %v815_v30 = vmul.f32 %v812_v28, %v761_v40 }
0x19c0   :  { %v1066_v14 = vpop.f32.mrf.mxu2 }
0x19c1   :  { %v1067_v15 = vadd.f32 %v1555_v32, %v1066_v14 }
0x19c3   :  { %1099 = vst [vmem:[#allocation8 + $0x48] sm:$0xff] %v1067_v15 }
0x1a04   :  { %v818_v27 = vpop.permute.xlu2 %817 }
0x1a05   :  { %v820_v29 = vmul.f32 %v818_v27, %v812_v28 }
0x1a07   :  { %822 = vrot.lane.b32.xlu0 %v820_v29, %s1386_s1 }
0x1a79   :  { %v823_v31 = vpop.permute.xlu0 %822 }
0x1a7a   :  { %v825_v33 = vadd.f32 %v823_v31, %v815_v30 }
0x1a7c   :  { %1284 = vtanh.f32 %v825_v33 }
0x1a82   :  { %v1285_v34 = vpop.eup %1284 }
0x1a83   :  { %828 = vrot.lane.b32.xlu1 %v1285_v34, %s1385_s0 }
0x1af5   :  { %v829_v35 = vpop.permute.xlu1 %828 }
0x1af6   :  { %v831_v36 = vmul.f32 %v829_v35, %v812_v28 }
0x1af8   :  { %833 = vrot.lane.b32.xlu2 %v831_v36, %s1386_s1 }
0x1b52   :  { %v834_v37 = vpop.permute.xlu2 %833 }
0x1b53   :  { %836 = vst.msk [vmem:[#allocation2 + $0x58] sm:$0xff] %vm131_vm4, %v834_v37  ;;  %1151 = vmatmul.msk.f32.vlgmr.msrb.gmra.mxu3 %vm131_vm4, %v834_v37 }
0x1b5a   :  { %v976_v43 = vld [vmem:[#allocation2 + $0x58] sm:$0xff] }
0x1b5b   :  { %1165 = vmatmul.msk.f32.vlgmr.msra.gmra.mxu3 %vm131_vm4, %v975_v42 }
0x1b63   :  { %1166 = vmatmul.msk.f32.gmra.mxu3 %vm131_vm4, %v976_v43 }
0x1bd6   :  { %v856_v44 = vpop.f32.mrf.mxu3 }
0x1bd7   :  { %v857_v47 = vadd.f32 %v1302_v46, %v856_v44 }
0x1bd9   :  { %1286 = vtanh.f32 %v857_v47  ;;  %v1152_v53 = vmul.f32 -1.442695, %v857_v47 }
0x1bdb   :  { %1288 = vpow2.f32 %v1152_v53 }
0x1bde   :  { %v1069_v48 = vpop.f32.mrf.mxu3 }
0x1bdf   :  { %v1287_v49 = vpop.eup %1286  ;;  %v1070_v50 = vadd.f32 %v1555_v32, %v1069_v48 }
0x1be0   :  { %881 = vrot.lane.b32.xlu0 %v1287_v49, %s1385_s0 }
0x1be1   :  { %1101 = vst [vmem:[#allocation8 + $0x50] sm:$0xff] %v1070_v50  ;;  %v1289_v54 = vpop.eup %1288 }
0x1be2   :  { %v862_v55 = vadd.f32 1.0, %v1289_v54 }
0x1be4   :  { %1290 = vrcp.f32 %v862_v55  ;;  %v874_v60 = vand.u32 2147483648, %v862_v55  ;;  %vm868_vm5 = vweird.f32 %v862_v55  ;;  %v872_v39 = vand.u32 2147483647, %v862_v55 }
0x1be6   :  { %v1072_v51 = vpop.f32.mrf.mxu3  ;;  %v875_v40 = vor.u32 1.1754944e-38, %v874_v60  ;;  %vm873_vm7 = vcmp.eq.f32.partialorder %v872_v39, 8.507059e+37 }
0x1be7   :  { %v1073_v52 = vadd.f32 %v1555_v32, %v1072_v51 }
0x1be9   :  { %1103 = vst [vmem:[#allocation8 + $0x58] sm:$0xff] %v1073_v52 }
0x1bea   :  { %v1291_v56 = vpop.eup %1290 }
0x1beb   :  { %v864_v57 = vmul.f32 %v1291_v56, %v862_v55  ;;  %vm869_vm3 = vweird.f32 %v1291_v56 }
0x1bec   :  { %vm870_vm6 = vmor %vm868_vm5, %vm869_vm3 }
0x1bed   :  { %v865_v58 = vsub.f32 1.0, %v864_v57 }
0x1bef   :  { %v866_v59 = vmul.f32 %v1291_v56, %v865_v58 }
0x1bf1   :  { %v867_v38 = vadd.f32 %v1291_v56, %v866_v59 }
0x1bf3   :  { %v871_v61 = vsel %vm870_vm6, %v1291_v56, %v867_v38 }
0x1bf4   :  { %v876_v62 = vsel %vm873_vm7, %v875_v40, %v871_v61 }
0x1bf5   :  { %v879_v0 = vmul.f32 %v876_v62, %v825_v33 }
0x1c52   :  { %v882_v41 = vpop.permute.xlu0 %881 }
0x1c53   :  { %v884_v63 = vmul.f32 %v882_v41, %v876_v62 }
0x1c55   :  { %886 = vrot.lane.b32.xlu1 %v884_v63, %s1386_s1 }
0x1cc7   :  { %v887_v1 = vpop.permute.xlu1 %886 }
0x1cc8   :  { %v889_v2 = vadd.f32 %v887_v1, %v879_v0 }
0x1cca   :  { %1292 = vtanh.f32 %v889_v2 }
0x1cd0   :  { %v1293_v3 = vpop.eup %1292 }
0x1cd1   :  { %892 = vrot.lane.b32.xlu2 %v1293_v3, %s1385_s0 }
0x1d2b   :  { %v893_v4 = vpop.permute.xlu2 %892 }
0x1d2c   :  { %v895_v5 = vmul.f32 %v893_v4, %v876_v62 }
0x1d2e   :  { %897 = vrot.lane.b32.xlu0 %v895_v5, %s1386_s1 }
0x1da0   :  { %v898_v6 = vpop.permute.xlu0 %897 }
0x1da1   :  { %900 = vst.msk [vmem:[#allocation2 + $0x60] sm:$0xff] %vm131_vm4, %v898_v6  ;;  %1153 = vmatmul.msk.f32.vlgmr.msrb.gmra.mxu0 %vm131_vm4, %v898_v6 }
0x1da8   :  { %v977_v8 = vld [vmem:[#allocation2 + $0x60] sm:$0xff] }
0x1da9   :  { %1155 = vmatmul.msk.f32.vlgmr.msra.gmra.mxu0 %vm131_vm4, %v965_v7  ;;  %1167 = vmatmul.msk.f32.gmra.mxu3 %vm131_vm4, %v977_v8 }
0x1db1   :  { %1156 = vmatmul.msk.f32.gmra.mxu0 %vm131_vm4, %v966_v9 }
0x1e1e   :  { %v920_v10 = vpop.f32.mrf.mxu0 }
0x1e1f   :  { %v921_v11 = vadd.f32 %v1302_v46, %v920_v10 }
0x1e21   :  { %1294 = vtanh.f32 %v921_v11  ;;  %v1154_v18 = vmul.f32 -1.442695, %v921_v11 }
0x1e23   :  { %1296 = vpow2.f32 %v1154_v18 }
0x1e26   :  { %v1039_v12 = vpop.f32.mrf.mxu0 }
0x1e27   :  { %v1295_v13 = vpop.eup %1294  ;;  %v1040_v14 = vadd.f32 %v1555_v32, %v1039_v12 }
0x1e28   :  { %945 = vrot.lane.b32.xlu1 %v1295_v13, %s1385_s0 }
0x1e29   :  { %1081 = vst [vmem:[#allocation8] sm:$0xff] %v1040_v14  ;;  %v1297_v19 = vpop.eup %1296 }
0x1e2a   :  { %v926_v20 = vadd.f32 1.0, %v1297_v19 }
0x1e2c   :  { %v1075_v15 = vpop.f32.mrf.mxu3  ;;  %1298 = vrcp.f32 %v926_v20  ;;  %v938_v26 = vand.u32 2147483648, %v926_v20  ;;  %vm932_vm9 = vweird.f32 %v926_v20  ;;  %v936_v27 = vand.u32 2147483647, %v926_v20 }
0x1e2d   :  { %v1076_v45 = vadd.f32 %v1555_v32, %v1075_v15 }
0x1e2e   :  { %v1042_v16 = vpop.f32.mrf.mxu0  ;;  %v939_v29 = vor.u32 1.1754944e-38, %v938_v26  ;;  %vm937_vm11 = vcmp.eq.f32.partialorder %v936_v27, 8.507059e+37 }
0x1e2f   :  { %1105 = vst [vmem:[#allocation8 + $0x60] sm:$0xff] %v1076_v45  ;;  %v1043_v17 = vadd.f32 %v1555_v32, %v1042_v16 }
0x1e31   :  { %1083 = vst [vmem:[#allocation8 + $0x8] sm:$0xff] %v1043_v17 }
0x1e32   :  { %v1299_v21 = vpop.eup %1298 }
0x1e33   :  { %v928_v22 = vmul.f32 %v1299_v21, %v926_v20  ;;  %vm933_vm8 = vweird.f32 %v1299_v21 }
0x1e34   :  { %vm934_vm10 = vmor %vm932_vm9, %vm933_vm8 }
0x1e35   :  { %v929_v23 = vsub.f32 1.0, %v928_v22 }
0x1e37   :  { %v930_v24 = vmul.f32 %v1299_v21, %v929_v23 }
0x1e39   :  { %v931_v25 = vadd.f32 %v1299_v21, %v930_v24 }
0x1e3b   :  { %v935_v28 = vsel %vm934_vm10, %v1299_v21, %v931_v25 }
0x1e3c   :  { %v940_v31 = vsel %vm937_vm11, %v939_v29, %v935_v28 }
0x1e3d   :  { %v943_v34 = vmul.f32 %v940_v31, %v889_v2 }
0x1e9a   :  { %v946_v30 = vpop.permute.xlu1 %945 }
0x1e9b   :  { %v948_v33 = vmul.f32 %v946_v30, %v940_v31 }
0x1e9d   :  { %950 = vrot.lane.b32.xlu2 %v948_v33, %s1386_s1 }
0x1ef7   :  { %v951_v35 = vpop.permute.xlu2 %950 }
0x1ef8   :  { %v953_v36 = vadd.f32 %v951_v35, %v943_v34 }
0x1efa   :  { %1300 = vtanh.f32 %v953_v36 }
0x1f00   :  { %v1301_v37 = vpop.eup %1300 }
0x1f01   :  { %956 = vrot.lane.b32.xlu0 %v1301_v37, %s1385_s0 }
0x1f73   :  { %v957_v42 = vpop.permute.xlu0 %956 }
0x1f74   :  { %v959_v43 = vmul.f32 %v957_v42, %v940_v31 }
0x1f76   :  { %961 = vrot.lane.b32.xlu1 %v959_v43, %s1386_s1 }
0x1fe8   :  { %v962_v44 = vpop.permute.xlu1 %961 }
0x1fe9   :  { %964 = vst.msk [vmem:[#allocation2 + $0x68] sm:$0xff] %vm131_vm4, %v962_v44 }
0x1ff0   :  { %v978_v46 = vld [vmem:[#allocation2 + $0x68] sm:$0xff] }
0x1ff1   :  { %1168 = vmatmul.msk.f32.gmra.mxu3 %vm131_vm4, %v978_v46 }
0x2074   :  { %v1078_v47 = vpop.f32.mrf.mxu3 }
0x2075   :  { %v1079_v48 = vadd.f32 %v1555_v32, %v1078_v47 }
0x2077   :  { %1107 = vst [vmem:[#allocation8 + $0x68] sm:$0xff] %v1079_v48 }
0x2078   :  { %1120 = dma.vmem_to_hbm [thread:$0]  %s1113_s22, 1792, %s1115_s25, [#allocation5], %s1383_s19, %s1383_s19, %s1384_s20  }
0x2079   :  { %1379 = dma.done.wait [#allocation5], 1792  }
0x207a   :  { %1380 = vsyncadd [#allocation5], 4294965504 }
0x207b   :  { %1125 = vsyncpa [#allocation4], 1 }
0x207c   :  { %1126 = vsyncpa [#allocation7], 1 }
0x207d   :  { %1127 = vsyncpa [#allocation5], 1 }

</bundles_post_ra>
